<compile_context>
chip_gen: v5e
topology: v5e:2x2
jax: 0.10.0
libtpu: 0.0.40
codegen_flags: <defaults>
</compile_context>

<pallas_src>
import numpy as np
import jax
import jax.numpy as jnp
from jax import lax
from jax.experimental import pallas as pl
from jax.experimental.pallas import tpu as pltpu

# ----------------------------- config (synthetic) -----------------------------
HIDDEN = 32
NUM_LAYERS = 2
VOCAB_SIZES = [11, 7]            # two node features ("features_name")
N_CLASSES = 5 + 1                # activity_info + 1
N_GRAPHS = 2
NODES_PER_GRAPH = 8
N_NODES = N_GRAPHS * NODES_PER_GRAPH
LN_EPS = 1e-5
LANES = 128
EMB_IN = 32                      # padded one-hot width (sum(V+1)=20 -> 32)

# --- wmat slab layout (bf16, 128 lanes, 16-row-aligned offsets) ---------------
OFF_E, OFF_FP1, OFF_FP2, OFF_FP3 = 0, 32, 96, 160
OFF_COMB = 192                   # + 4*H*l per layer
OFF_CW1, OFF_CW2, OFF_CW3 = 448, 480, 512
WMAT_ROWS = 544

# --- wbias slab layout (f32, (16, 256)) ----------------------------------------
ROW_BL = 0                       # + l          fused LSTM gate bias (256 lanes)
ROW_FPB1, ROW_FPB2, ROW_FPB3 = 2, 3, 4
ROW_BSUM = 5                     # + l          summed SAGE biases
ROW_GAMMA = 7                    # + 2*l
ROW_BETA = 8                     # + 2*l
ROW_CB1, ROW_CB2, ROW_CB3 = 11, 12, 13
WBIAS_ROWS, WBIAS_COLS = 16, 256


# ----------------------------- kernel helpers ----------------------------------
def _mxu(a, b):
    """bf16 MXU matmul with f32 accumulation (element-wise math stays f32)."""
    return jnp.dot(a.astype(jnp.bfloat16), b.astype(jnp.bfloat16),
                   preferred_element_type=jnp.float32)


def _make_fused_kernel(t_max, num_layers, hidden, eps, n_graphs, npg):
    H = hidden
    N = n_graphs * npg
    TN = t_max * N

    def kernel(oh_ref, adj_ref, invdeg_ref, sel_ref, msk_ref,
               wlstm_ref, wmat_ref, wbias_ref, o_ref):
        oh = oh_ref[...]             # (N, EMB_IN) bf16 padded one-hots
        adj = adj_ref[...]           # (N, N)      bf16 block-diag repeat_next adj
        inv_deg = invdeg_ref[...]    # (N, 1)      f32  precomputed 1/max(deg,1)
        sel = sel_ref[...]           # (2*T*N, N)  bf16 stacked fw|bw neighbor select
        keep_all = msk_ref[...] > 0.0  # (T, N, 2H) hoisted valid-step compare

        def wm(r0, rows, cols):      # static slice of the packed weight slab
            return wmat_ref[r0:r0 + rows, 0:cols]

        def wb(row, cols):           # static slice of the packed bias slab
            return wbias_ref[row:row + 1, 0:cols]

        # tanh lane mask for the 'g' gate (PyTorch gate order i,f,g,o; gate k
        # occupies lanes [2H*k, 2H*(k+1)) with fw|bw halves).
        lane = lax.broadcasted_iota(jnp.int32, (N, 8 * H), 1)
        is_g = (lane >= 4 * H) & (lane < 6 * H)

        # ---- embedding lookup (block-diag one-hot matmul) + feature_proj MLP ----
        e = _mxu(oh, wm(OFF_E, 32, 2 * H))                         # (N, 2H) = [e0|e1]
        h = jnp.maximum(_mxu(e, wm(OFF_FP1, 2 * H, 2 * H)) + wb(ROW_FPB1, 2 * H), 0.0)
        h = jnp.maximum(_mxu(h, wm(OFF_FP2, 2 * H, H)) + wb(ROW_FPB2, H), 0.0)
        h = _mxu(h, wm(OFF_FP3, H, H)) + wb(ROW_FPB3, H)

        # ---- hetero SAGE layers (all VMEM-resident) ----
        for l in range(num_layers):
            residual = h
            # repeat_next: mean aggregator (selection matmul + precomputed 1/deg)
            neigh_rp = _mxu(adj, h) * inv_deg                      # (N, H)

            # forward+backward LSTM aggregators with fused gates and fused
            # directions: state hc = [h_fw | h_bw] (N, 2H); gates laid out as
            # [i_fw|i_bw | f_fw|f_bw | g_fw|g_bw | o_fw|o_bw] (N, 8H).
            xfl = _mxu(sel, h)                                     # (2*T*N, H)
            xcat = jnp.concatenate([xfl[:TN], xfl[TN:]], axis=1)   # (T*N, 2H)
            gx = _mxu(xcat, wlstm_ref[2 * l]) \
                + wbias_ref[ROW_BL + l:ROW_BL + l + 1, :]          # (T*N, 8H)
            whh = wlstm_ref[2 * l + 1]                             # (2H, 8H) block-diag
            hc = jnp.zeros((N, 2 * H), jnp.float32)
            cc = jnp.zeros((N, 2 * H), jnp.float32)
            for t in range(t_max):                                 # static unroll
                gates = gx[t * N:(t + 1) * N] + _mxu(hc, whh)      # (N, 8H)
                acts = jnp.where(is_g, jnp.tanh(gates), jax.nn.sigmoid(gates))
                i_g = acts[:, 0:2 * H]
                f_g = acts[:, 2 * H:4 * H]
                g_g = acts[:, 4 * H:6 * H]
                o_g = acts[:, 6 * H:8 * H]
                c_new = f_g * cc + i_g * g_g
                h_new = o_g * jnp.tanh(c_new)
                keep = keep_all[t]                                 # (N, 2H)
                hc = jnp.where(keep, h_new, hc)                    # freeze past length
                cc = jnp.where(keep, c_new, cc)

            # Sum of the three SAGEConv outputs via ONE lane-dense matmul:
            #   Wcomb = [Ws_fw+Ws_bw+Ws_rp ; Wn_rp ; Wn_fw ; Wn_bw]  (4H, H)
            xin = jnp.concatenate([h, neigh_rp, hc], axis=1)       # (N, 4H=128)
            out_sum = _mxu(xin, wm(OFF_COMB + 4 * H * l, 4 * H, H)) + wb(ROW_BSUM + l, H)

            # HeteroGraphConv aggregate='mean' + residual + LayerNorm + ReLU
            # TODO(synk): DGL skips relations with zero edges in a graph; the
            # fixed *(1/3) assumes all three edge types are present (true here).
            x = out_sum * (1.0 / 3.0) + residual
            mu = jnp.mean(x, axis=-1, keepdims=True)
            var = jnp.mean((x - mu) ** 2, axis=-1, keepdims=True)
            y = ((x - mu) * lax.rsqrt(var + eps) * wb(ROW_GAMMA + 2 * l, H)
                 + wb(ROW_BETA + 2 * l, H))
            h = jnp.maximum(y, 0.0)
            # TODO(synk): nn.Dropout is identity in eval mode; training-mode
            # dropout is not emitted.

        # ---- readout (dgl.max_nodes: per-graph max over nodes) + classifier ----
        gmax = jnp.concatenate(
            [jnp.max(h[g * npg:(g + 1) * npg], axis=0, keepdims=True)
             for g in range(n_graphs)], axis=0)                    # (G, H)
        c = jnp.maximum(_mxu(gmax, wm(OFF_CW1, H, H)) + wb(ROW_CB1, H), 0.0)
        c = jnp.maximum(_mxu(c, wm(OFF_CW2, H, H)) + wb(ROW_CB2, H), 0.0)
        logits = _mxu(c, wm(OFF_CW3, H, LANES)) + wb(ROW_CB3, LANES)  # (G, 128) lane-dense
        o_ref[...] = logits.astype(o_ref.dtype)

    return kernel


# ----------------------------- pallas_call wrapper -----------------------------
def _full_spec(shape):
    nd = len(shape)
    return pl.BlockSpec(tuple(shape), lambda i, _nd=nd: (0,) * _nd)


def hetero_sage_forward(graph, params):
    """Single fused pallas_call; all graphs batched into one block (grid=(1,))."""
    inputs = [graph["oh"], graph["adj_rp"], graph["inv_deg_rp"],
              graph["sel_stack"], graph["msk_cat"],
              params["wlstm"], params["wmat"], params["wbias"]]
    kernel = _make_fused_kernel(graph["t_max"], NUM_LAYERS, HIDDEN, LN_EPS,
                                N_GRAPHS, NODES_PER_GRAPH)
    out = pl.pallas_call(
        kernel,
        out_shape=jax.ShapeDtypeStruct((N_GRAPHS, LANES), jnp.float32),
        grid=(1,),
        in_specs=[_full_spec(x.shape) for x in inputs],
        out_specs=pl.BlockSpec((N_GRAPHS, LANES), lambda i: (0, 0)),
        compiler_params=pltpu.CompilerParams(
            dimension_semantics=("arbitrary",)),
    )(*inputs)
    return out[:, :N_CLASSES]                  # lane-dense store, slice on host


# ----------------------------- synthetic graph / params ------------------------
def build_graph_data(rng):
    npg, G, N, H = NODES_PER_GRAPH, N_GRAPHS, N_NODES, HIDDEN
    fw = [set() for _ in range(G)]
    bw = [set() for _ in range(G)]
    rp = [set() for _ in range(G)]
    for g in range(G):
        for i in range(npg - 1):                                  # trace order
            fw[g].add((i, i + 1)); bw[g].add((i + 1, i))
        for _ in range(6):                                        # extra random edges
            s, d = rng.randint(npg), rng.randint(npg)
            fw[g].add((s, d)); bw[g].add((d, s))
        for _ in range(8):
            s, d = rng.randint(npg), rng.randint(npg)
            rp[g].add((s, d))

    def dense(per_graph_edges):
        adj = np.zeros((N, N), np.float32)     # block-diagonal, adj[dst, src]
        for g, es in enumerate(per_graph_edges):
            for (s, d) in es:
                adj[g * npg + d, g * npg + s] = 1.0
        return adj

    adj_fw, adj_bw, adj_rp = dense(fw), dense(bw), dense(rp)
    deg_rp = adj_rp.sum(axis=-1, keepdims=True)
    inv_deg_rp = 1.0 / np.maximum(deg_rp, 1.0)                    # zero in-degree -> 0
    t_max = int(max(adj_fw.sum(-1).max(), adj_bw.sum(-1).max(), 1.0))

    def seq_select(adj):
        # sel[t*N + d, s] = 1 iff s is the t-th in-neighbor of d.
        # TODO(synk): DGL's LSTM reducer order over an unordered neighbor set is
        # implementation-defined; neighbors are ordered by ascending source id.
        sel = np.zeros((t_max * N, N), np.float32)
        msk = np.zeros((t_max, N), np.float32)
        for d in range(N):
            srcs = np.nonzero(adj[d])[0]
            for t, s in enumerate(srcs):
                sel[t * N + d, s] = 1.0
                msk[t, d] = 1.0
        return sel, msk

    sel_fw, msk_fw = seq_select(adj_fw)
    sel_bw, msk_bw = seq_select(adj_bw)
    sel_stack = np.concatenate([sel_fw, sel_bw], axis=0)          # (2*T*N, N)
    msk_cat = np.concatenate(                                     # (T, N, 2H) fw|bw
        [np.repeat(msk_fw[:, :, None], H, axis=2),
         np.repeat(msk_bw[:, :, None], H, axis=2)], axis=2)

    return {
        "adj_rp": jnp.asarray(adj_rp, jnp.bfloat16),
        "inv_deg_rp": jnp.asarray(inv_deg_rp, jnp.float32),
        "sel_stack": jnp.asarray(sel_stack, jnp.bfloat16),
        "msk_cat": jnp.asarray(msk_cat, jnp.float32),
        "t_max": t_max,
    }


def build_node_onehots(node_feats):
    oh = np.zeros((N_NODES, EMB_IN), np.float32)
    col0 = 0
    for k, v in enumerate(VOCAB_SIZES):
        for i in range(N_NODES):
            oh[i, col0 + int(node_feats[i, k])] = 1.0
        col0 += v + 1
    return {"oh": jnp.asarray(oh, jnp.bfloat16)}


def init_params(key):
    H, L = HIDDEN, NUM_LAYERS
    f32 = np.float32
    ks = iter(jax.random.split(key, 64))

    def normal(shape, std):
        return np.asarray(jax.random.normal(next(ks), shape), f32) * std

    def kaiming(fin, fout):                                       # kaiming(relu)
        return normal((fin, fout), np.sqrt(2.0 / fin))

    bound = 1.0 / np.sqrt(H)

    def lstm_u(shape):                                            # PyTorch LSTM default
        return np.asarray(jax.random.uniform(next(ks), shape, jnp.float32,
                                             -bound, bound), f32)

    # raw parameters -------------------------------------------------------
    E0 = normal((VOCAB_SIZES[0] + 1, H), 0.1)
    E1 = normal((VOCAB_SIZES[1] + 1, H), 0.1)
    fp_w1 = kaiming(2 * H, 2 * H)
    fp_w2 = kaiming(2 * H, H)
    fp_w3 = kaiming(H, H)
    cw1 = kaiming(H, H)
    cw2 = kaiming(H, H)
    cw3 = kaiming(H, N_CLASSES)

    # wlstm slab: fused-gate, fused-direction block-diagonal LSTM weights ----
    # layout: lanes [2H*k + H*d : 2H*k + H*(d+1)] = gate k (i,f,g,o), dir d (fw,bw)
    wlstm = np.zeros((2 * L, 2 * H, 8 * H), f32)
    for l in range(L):
        for d in range(2):                     # 0 = forward, 1 = backward
            wih = lstm_u((4, H, H))
            whh = lstm_u((4, H, H))
            for k in range(4):
                c0 = 2 * H * k + H * d
                wlstm[2 * l + 0, H * d:H * (d + 1), c0:c0 + H] = wih[k]
                wlstm[2 * l + 1, H * d:H * (d + 1), c0:c0 + H] = whh[k]

    # wmat slab: all other weight matrices, lane-padded to 128 ---------------
    wmat = np.zeros((WMAT_ROWS, LANES), f32)
    E_blk = np.zeros((32, 2 * H), f32)                            # block-diag embeddings
    v0, v1 = VOCAB_SIZES[0] + 1, VOCAB_SIZES[1] + 1
    E_blk[0:v0, 0:H] = E0
    E_blk[v0:v0 + v1, H:2 * H] = E1
    wmat[OFF_E:OFF_E + 32, 0:2 * H] = E_blk
    wmat[OFF_FP1:OFF_FP1 + 2 * H, 0:2 * H] = fp_w1
    wmat[OFF_FP2:OFF_FP2 + 2 * H, 0:H] = fp_w2
    wmat[OFF_FP3:OFF_FP3 + H, 0:H] = fp_w3
    for l in range(L):
        ws_fw, ws_bw, ws_rp = kaiming(H, H), kaiming(H, H), kaiming(H, H)
        wn_fw, wn_bw, wn_rp = kaiming(H, H), kaiming(H, H), kaiming(H, H)
        r0 = OFF_COMB + 4 * H * l
        wmat[r0 + 0 * H:r0 + 1 * H, 0:H] = ws_fw + ws_bw + ws_rp  # self weights pre-summed
        wmat[r0 + 1 * H:r0 + 2 * H, 0:H] = wn_rp
        wmat[r0 + 2 * H:r0 + 3 * H, 0:H] = wn_fw
        wmat[r0 + 3 * H:r0 + 4 * H, 0:H] = wn_bw
    wmat[OFF_CW1:OFF_CW1 + H, 0:H] = cw1
    wmat[OFF_CW2:OFF_CW2 + H, 0:H] = cw2
    wmat[OFF_CW3:OFF_CW3 + H, 0:N_CLASSES] = cw3                  # lane-padded classifier

    # wbias slab (init_weights sets every bias to 0; LayerNorm gamma = 1) -----
    wbias = np.zeros((WBIAS_ROWS, WBIAS_COLS), f32)
    for l in range(L):
        wbias[ROW_GAMMA + 2 * l, 0:H] = 1.0

    return {"wlstm": jnp.asarray(wlstm, jnp.bfloat16),
            "wmat": jnp.asarray(wmat, jnp.bfloat16),
            "wbias": jnp.asarray(wbias, jnp.float32)}


# ----------------------------- main --------------------------------------------
if __name__ == "__main__":
    rng = np.random.RandomState(0)
    graph = build_graph_data(rng)
    node_feats = np.stack(
        [rng.randint(0, v + 1, size=(N_NODES,)) for v in VOCAB_SIZES], axis=1)
    graph.update(build_node_onehots(node_feats))
    params = init_params(jax.random.PRNGKey(0))

    logits = hetero_sage_forward(graph, params)
    logits = jax.block_until_ready(logits)

    assert logits.shape == (N_GRAPHS, N_CLASSES), logits.shape
    assert bool(jnp.all(jnp.isfinite(logits)))
    print("KERNEL_OK")
</pallas_src>

<mosaic_0001>
module attributes {stable_mosaic.version = 11 : i64} {
  func.func @kernel(%arg0: i32, %arg1: memref<16x32xbf16, #tpu.memory_space<vmem>>, %arg2: memref<16x16xbf16, #tpu.memory_space<vmem>>, %arg3: memref<16x1xf32, #tpu.memory_space<vmem>>, %arg4: memref<96x16xbf16, #tpu.memory_space<vmem>>, %arg5: memref<3x16x64xf32, #tpu.memory_space<vmem>>, %arg6: memref<4x64x256xbf16, #tpu.memory_space<vmem>>, %arg7: memref<544x128xbf16, #tpu.memory_space<vmem>>, %arg8: memref<16x256xf32, #tpu.memory_space<vmem>>, %arg9: memref<2x128xf32, #tpu.memory_space<vmem>>) attributes {dimension_semantics = [#tpu.dimension_semantics<arbitrary>], iteration_bounds = array<i64: 1>, scalar_prefetch = 0 : i64, scratch_operands = 0 : i64, tpu.core_type = #tpu.core_type<tc>, window_params = [{pipeline_mode = #tpu.pipeline_mode<synchronous>, transform_indices = @transform_0, window_bounds = array<i64: 16, 32>}, {pipeline_mode = #tpu.pipeline_mode<synchronous>, transform_indices = @transform_1, window_bounds = array<i64: 16, 16>}, {pipeline_mode = #tpu.pipeline_mode<synchronous>, transform_indices = @transform_2, window_bounds = array<i64: 16, 1>}, {pipeline_mode = #tpu.pipeline_mode<synchronous>, transform_indices = @transform_3, window_bounds = array<i64: 96, 16>}, {pipeline_mode = #tpu.pipeline_mode<synchronous>, transform_indices = @transform_4, window_bounds = array<i64: 3, 16, 64>}, {pipeline_mode = #tpu.pipeline_mode<synchronous>, transform_indices = @transform_5, window_bounds = array<i64: 4, 64, 256>}, {pipeline_mode = #tpu.pipeline_mode<synchronous>, transform_indices = @transform_6, window_bounds = array<i64: 544, 128>}, {pipeline_mode = #tpu.pipeline_mode<synchronous>, transform_indices = @transform_7, window_bounds = array<i64: 16, 256>}, {pipeline_mode = #tpu.pipeline_mode<synchronous>, transform_indices = @transform_8, window_bounds = array<i64: 2, 128>}]} {
    %c0 = arith.constant 0 : index
    %c0_0 = arith.constant 0 : index
    %0 = vector.load %arg1[%c0, %c0_0] : memref<16x32xbf16, #tpu.memory_space<vmem>>, vector<16x32xbf16>
    %c0_1 = arith.constant 0 : index
    %c0_2 = arith.constant 0 : index
    %1 = vector.load %arg2[%c0_1, %c0_2] : memref<16x16xbf16, #tpu.memory_space<vmem>>, vector<16x16xbf16>
    %c0_3 = arith.constant 0 : index
    %c0_4 = arith.constant 0 : index
    %2 = vector.load %arg3[%c0_3, %c0_4] : memref<16x1xf32, #tpu.memory_space<vmem>>, vector<16x1xf32>
    %c0_5 = arith.constant 0 : index
    %c0_6 = arith.constant 0 : index
    %3 = vector.load %arg4[%c0_5, %c0_6] : memref<96x16xbf16, #tpu.memory_space<vmem>>, vector<96x16xbf16>
    %c0_7 = arith.constant 0 : index
    %c0_8 = arith.constant 0 : index
    %c0_9 = arith.constant 0 : index
    %4 = vector.load %arg5[%c0_7, %c0_8, %c0_9] : memref<3x16x64xf32, #tpu.memory_space<vmem>>, vector<3x16x64xf32>
    %cst = arith.constant 0.000000e+00 : f32
    %5 = vector.broadcast %cst : f32 to vector<3x16x64xf32>
    %6 = arith.cmpf ogt, %4, %5 : vector<3x16x64xf32>
    %7 = tpu.iota {dimensions = array<i32: 1>} : vector<16x256xi32>
    %c128_i32 = arith.constant 128 : i32
    %8 = vector.broadcast %c128_i32 : i32 to vector<16x256xi32>
    %9 = arith.cmpi sge, %7, %8 : vector<16x256xi32>
    %c192_i32 = arith.constant 192 : i32
    %10 = vector.broadcast %c192_i32 : i32 to vector<16x256xi32>
    %11 = arith.cmpi slt, %7, %10 : vector<16x256xi32>
    %12 = arith.andi %9, %11 : vector<16x256xi1>
    %c0_10 = arith.constant 0 : index
    %c0_11 = arith.constant 0 : index
    %13 = vector.load %arg7[%c0_10, %c0_11] : memref<544x128xbf16, #tpu.memory_space<vmem>>, vector<32x64xbf16>
    %cst_12 = arith.constant dense<0.000000e+00> : vector<16x64xf32>
    %14 = tpu.matmul %0, %13, %cst_12 {dimension_numbers = #tpu.dot_dimension_numbers<[1], [0], [0], [1], [0, 0, 1, 1], [], []>} : vector<16x32xbf16>, vector<32x64xbf16>, vector<16x64xf32> -> vector<16x64xf32>
    %c32 = arith.constant 32 : index
    %c0_13 = arith.constant 0 : index
    %15 = vector.load %arg7[%c32, %c0_13] : memref<544x128xbf16, #tpu.memory_space<vmem>>, vector<64x64xbf16>
    %16 = arith.truncf %14 : vector<16x64xf32> to vector<16x64xbf16>
    %cst_14 = arith.constant dense<0.000000e+00> : vector<16x64xf32>
    %17 = tpu.matmul %16, %15, %cst_14 {dimension_numbers = #tpu.dot_dimension_numbers<[1], [0], [0], [1], [0, 0, 1, 1], [], []>} : vector<16x64xbf16>, vector<64x64xbf16>, vector<16x64xf32> -> vector<16x64xf32>
    %c2 = arith.constant 2 : index
    %c0_15 = arith.constant 0 : index
    %18 = vector.load %arg8[%c2, %c0_15] : memref<16x256xf32, #tpu.memory_space<vmem>>, vector<1x64xf32>
    %19 = vector.broadcast %18 : vector<1x64xf32> to vector<16x64xf32>
    %20 = arith.addf %17, %19 : vector<16x64xf32>
    %cst_16 = arith.constant 0.000000e+00 : f32
    %21 = vector.broadcast %cst_16 : f32 to vector<16x64xf32>
    %22 = arith.maximumf %20, %21 : vector<16x64xf32>
    %c96 = arith.constant 96 : index
    %c0_17 = arith.constant 0 : index
    %23 = vector.load %arg7[%c96, %c0_17] : memref<544x128xbf16, #tpu.memory_space<vmem>>, vector<64x32xbf16>
    %24 = arith.truncf %22 : vector<16x64xf32> to vector<16x64xbf16>
    %cst_18 = arith.constant dense<0.000000e+00> : vector<16x32xf32>
    %25 = tpu.matmul %24, %23, %cst_18 {dimension_numbers = #tpu.dot_dimension_numbers<[1], [0], [0], [1], [0, 0, 1, 1], [], []>} : vector<16x64xbf16>, vector<64x32xbf16>, vector<16x32xf32> -> vector<16x32xf32>
    %c3 = arith.constant 3 : index
    %c0_19 = arith.constant 0 : index
    %26 = vector.load %arg8[%c3, %c0_19] : memref<16x256xf32, #tpu.memory_space<vmem>>, vector<1x32xf32>
    %27 = vector.broadcast %26 : vector<1x32xf32> to vector<16x32xf32>
    %28 = arith.addf %25, %27 : vector<16x32xf32>
    %cst_20 = arith.constant 0.000000e+00 : f32
    %29 = vector.broadcast %cst_20 : f32 to vector<16x32xf32>
    %30 = arith.maximumf %28, %29 : vector<16x32xf32>
    %c160 = arith.constant 160 : index
    %c0_21 = arith.constant 0 : index
    %31 = vector.load %arg7[%c160, %c0_21] : memref<544x128xbf16, #tpu.memory_space<vmem>>, vector<32x32xbf16>
    %32 = arith.truncf %30 : vector<16x32xf32> to vector<16x32xbf16>
    %cst_22 = arith.constant dense<0.000000e+00> : vector<16x32xf32>
    %33 = tpu.matmul %32, %31, %cst_22 {dimension_numbers = #tpu.dot_dimension_numbers<[1], [0], [0], [1], [0, 0, 1, 1], [], []>} : vector<16x32xbf16>, vector<32x32xbf16>, vector<16x32xf32> -> vector<16x32xf32>
    %c4 = arith.constant 4 : index
    %c0_23 = arith.constant 0 : index
    %34 = vector.load %arg8[%c4, %c0_23] : memref<16x256xf32, #tpu.memory_space<vmem>>, vector<1x32xf32>
    %35 = vector.broadcast %34 : vector<1x32xf32> to vector<16x32xf32>
    %36 = arith.addf %33, %35 : vector<16x32xf32>
    %37 = arith.truncf %36 : vector<16x32xf32> to vector<16x32xbf16>
    %cst_24 = arith.constant dense<0.000000e+00> : vector<16x32xf32>
    %38 = tpu.matmul %1, %37, %cst_24 {dimension_numbers = #tpu.dot_dimension_numbers<[1], [0], [0], [1], [0, 0, 1, 1], [], []>} : vector<16x16xbf16>, vector<16x32xbf16>, vector<16x32xf32> -> vector<16x32xf32>
    %39 = vector.broadcast %2 : vector<16x1xf32> to vector<16x32xf32>
    %40 = arith.mulf %38, %39 : vector<16x32xf32>
    %41 = arith.truncf %36 : vector<16x32xf32> to vector<16x32xbf16>
    %cst_25 = arith.constant dense<0.000000e+00> : vector<96x32xf32>
    %42 = tpu.matmul %3, %41, %cst_25 {dimension_numbers = #tpu.dot_dimension_numbers<[1], [0], [0], [1], [0, 0, 1, 1], [], []>} : vector<96x16xbf16>, vector<16x32xbf16>, vector<96x32xf32> -> vector<96x32xf32>
    %43 = vector.extract_strided_slice %42 {offsets = [0, 0], sizes = [48, 32], strides = [1, 1]} : vector<96x32xf32> to vector<48x32xf32>
    %44 = vector.extract_strided_slice %42 {offsets = [48, 0], sizes = [48, 32], strides = [1, 1]} : vector<96x32xf32> to vector<48x32xf32>
    %45 = tpu.concatenate %43, %44 in 1 : vector<48x32xf32>, vector<48x32xf32> -> vector<48x64xf32>
    %c0_26 = arith.constant 0 : index
    %c0_27 = arith.constant 0 : index
    %c0_28 = arith.constant 0 : index
    %46 = vector.load %arg6[%c0_26, %c0_27, %c0_28] : memref<4x64x256xbf16, #tpu.memory_space<vmem>>, vector<1x64x256xbf16>
    %47 = vector.shape_cast %46 : vector<1x64x256xbf16> to vector<64x256xbf16>
    %48 = arith.truncf %45 : vector<48x64xf32> to vector<48x64xbf16>
    %cst_29 = arith.constant dense<0.000000e+00> : vector<48x256xf32>
    %49 = tpu.matmul %48, %47, %cst_29 {dimension_numbers = #tpu.dot_dimension_numbers<[1], [0], [0], [1], [0, 0, 1, 1], [], []>} : vector<48x64xbf16>, vector<64x256xbf16>, vector<48x256xf32> -> vector<48x256xf32>
    %c0_30 = arith.constant 0 : index
    %c0_31 = arith.constant 0 : index
    %50 = vector.load %arg8[%c0_30, %c0_31] : memref<16x256xf32, #tpu.memory_space<vmem>>, vector<1x256xf32>
    %51 = vector.broadcast %50 : vector<1x256xf32> to vector<48x256xf32>
    %52 = arith.addf %49, %51 : vector<48x256xf32>
    %c1 = arith.constant 1 : index
    %c0_32 = arith.constant 0 : index
    %c0_33 = arith.constant 0 : index
    %53 = vector.load %arg6[%c1, %c0_32, %c0_33] : memref<4x64x256xbf16, #tpu.memory_space<vmem>>, vector<1x64x256xbf16>
    %54 = vector.shape_cast %53 : vector<1x64x256xbf16> to vector<64x256xbf16>
    %cst_34 = arith.constant 0.000000e+00 : f32
    %55 = vector.broadcast %cst_34 : f32 to vector<16x64xf32>
    %cst_35 = arith.constant 0.000000e+00 : f32
    %56 = vector.broadcast %cst_35 : f32 to vector<16x64xf32>
    %57 = vector.extract_strided_slice %52 {offsets = [0, 0], sizes = [16, 256], strides = [1, 1]} : vector<48x256xf32> to vector<16x256xf32>
    %58 = arith.truncf %55 : vector<16x64xf32> to vector<16x64xbf16>
    %cst_36 = arith.constant dense<0.000000e+00> : vector<16x256xf32>
    %59 = tpu.matmul %58, %54, %cst_36 {dimension_numbers = #tpu.dot_dimension_numbers<[1], [0], [0], [1], [0, 0, 1, 1], [], []>} : vector<16x64xbf16>, vector<64x256xbf16>, vector<16x256xf32> -> vector<16x256xf32>
    %60 = arith.addf %57, %59 : vector<16x256xf32>
    %61 = math.tanh %60 : vector<16x256xf32>
    %62 = arith.negf %60 : vector<16x256xf32>
    %63 = math.exp %62 : vector<16x256xf32>
    %cst_37 = arith.constant 1.000000e+00 : f32
    %64 = vector.broadcast %cst_37 : f32 to vector<16x256xf32>
    %65 = arith.addf %64, %63 : vector<16x256xf32>
    %66 = arith.divf %64, %65 : vector<16x256xf32>
    %67 = arith.select %12, %61, %66 : vector<16x256xi1>, vector<16x256xf32>
    %68 = vector.extract_strided_slice %67 {offsets = [0, 0], sizes = [16, 64], strides = [1, 1]} : vector<16x256xf32> to vector<16x64xf32>
    %69 = vector.extract_strided_slice %67 {offsets = [0, 64], sizes = [16, 64], strides = [1, 1]} : vector<16x256xf32> to vector<16x64xf32>
    %70 = vector.extract_strided_slice %67 {offsets = [0, 128], sizes = [16, 64], strides = [1, 1]} : vector<16x256xf32> to vector<16x64xf32>
    %71 = vector.extract_strided_slice %67 {offsets = [0, 192], sizes = [16, 64], strides = [1, 1]} : vector<16x256xf32> to vector<16x64xf32>
    %72 = arith.mulf %69, %56 : vector<16x64xf32>
    %73 = arith.mulf %68, %70 : vector<16x64xf32>
    %74 = arith.addf %72, %73 : vector<16x64xf32>
    %75 = math.tanh %74 : vector<16x64xf32>
    %76 = arith.mulf %71, %75 : vector<16x64xf32>
    %77 = vector.extract_strided_slice %6 {offsets = [0, 0, 0], sizes = [1, 16, 64], strides = [1, 1, 1]} : vector<3x16x64xi1> to vector<1x16x64xi1>
    %78 = vector.shape_cast %77 : vector<1x16x64xi1> to vector<16x64xi1>
    %79 = arith.select %78, %76, %55 : vector<16x64xi1>, vector<16x64xf32>
    %80 = arith.select %78, %74, %56 : vector<16x64xi1>, vector<16x64xf32>
    %81 = vector.extract_strided_slice %52 {offsets = [16, 0], sizes = [16, 256], strides = [1, 1]} : vector<48x256xf32> to vector<16x256xf32>
    %82 = arith.truncf %79 : vector<16x64xf32> to vector<16x64xbf16>
    %cst_38 = arith.constant dense<0.000000e+00> : vector<16x256xf32>
    %83 = tpu.matmul %82, %54, %cst_38 {dimension_numbers = #tpu.dot_dimension_numbers<[1], [0], [0], [1], [0, 0, 1, 1], [], []>} : vector<16x64xbf16>, vector<64x256xbf16>, vector<16x256xf32> -> vector<16x256xf32>
    %84 = arith.addf %81, %83 : vector<16x256xf32>
    %85 = math.tanh %84 : vector<16x256xf32>
    %86 = arith.negf %84 : vector<16x256xf32>
    %87 = math.exp %86 : vector<16x256xf32>
    %cst_39 = arith.constant 1.000000e+00 : f32
    %88 = vector.broadcast %cst_39 : f32 to vector<16x256xf32>
    %89 = arith.addf %88, %87 : vector<16x256xf32>
    %90 = arith.divf %88, %89 : vector<16x256xf32>
    %91 = arith.select %12, %85, %90 : vector<16x256xi1>, vector<16x256xf32>
    %92 = vector.extract_strided_slice %91 {offsets = [0, 0], sizes = [16, 64], strides = [1, 1]} : vector<16x256xf32> to vector<16x64xf32>
    %93 = vector.extract_strided_slice %91 {offsets = [0, 64], sizes = [16, 64], strides = [1, 1]} : vector<16x256xf32> to vector<16x64xf32>
    %94 = vector.extract_strided_slice %91 {offsets = [0, 128], sizes = [16, 64], strides = [1, 1]} : vector<16x256xf32> to vector<16x64xf32>
    %95 = vector.extract_strided_slice %91 {offsets = [0, 192], sizes = [16, 64], strides = [1, 1]} : vector<16x256xf32> to vector<16x64xf32>
    %96 = arith.mulf %93, %80 : vector<16x64xf32>
    %97 = arith.mulf %92, %94 : vector<16x64xf32>
    %98 = arith.addf %96, %97 : vector<16x64xf32>
    %99 = math.tanh %98 : vector<16x64xf32>
    %100 = arith.mulf %95, %99 : vector<16x64xf32>
    %101 = vector.extract_strided_slice %6 {offsets = [1, 0, 0], sizes = [1, 16, 64], strides = [1, 1, 1]} : vector<3x16x64xi1> to vector<1x16x64xi1>
    %102 = vector.shape_cast %101 : vector<1x16x64xi1> to vector<16x64xi1>
    %103 = arith.select %102, %100, %79 : vector<16x64xi1>, vector<16x64xf32>
    %104 = arith.select %102, %98, %80 : vector<16x64xi1>, vector<16x64xf32>
    %105 = vector.extract_strided_slice %52 {offsets = [32, 0], sizes = [16, 256], strides = [1, 1]} : vector<48x256xf32> to vector<16x256xf32>
    %106 = arith.truncf %103 : vector<16x64xf32> to vector<16x64xbf16>
    %cst_40 = arith.constant dense<0.000000e+00> : vector<16x256xf32>
    %107 = tpu.matmul %106, %54, %cst_40 {dimension_numbers = #tpu.dot_dimension_numbers<[1], [0], [0], [1], [0, 0, 1, 1], [], []>} : vector<16x64xbf16>, vector<64x256xbf16>, vector<16x256xf32> -> vector<16x256xf32>
    %108 = arith.addf %105, %107 : vector<16x256xf32>
    %109 = math.tanh %108 : vector<16x256xf32>
    %110 = arith.negf %108 : vector<16x256xf32>
    %111 = math.exp %110 : vector<16x256xf32>
    %cst_41 = arith.constant 1.000000e+00 : f32
    %112 = vector.broadcast %cst_41 : f32 to vector<16x256xf32>
    %113 = arith.addf %112, %111 : vector<16x256xf32>
    %114 = arith.divf %112, %113 : vector<16x256xf32>
    %115 = arith.select %12, %109, %114 : vector<16x256xi1>, vector<16x256xf32>
    %116 = vector.extract_strided_slice %115 {offsets = [0, 0], sizes = [16, 64], strides = [1, 1]} : vector<16x256xf32> to vector<16x64xf32>
    %117 = vector.extract_strided_slice %115 {offsets = [0, 64], sizes = [16, 64], strides = [1, 1]} : vector<16x256xf32> to vector<16x64xf32>
    %118 = vector.extract_strided_slice %115 {offsets = [0, 128], sizes = [16, 64], strides = [1, 1]} : vector<16x256xf32> to vector<16x64xf32>
    %119 = vector.extract_strided_slice %115 {offsets = [0, 192], sizes = [16, 64], strides = [1, 1]} : vector<16x256xf32> to vector<16x64xf32>
    %120 = arith.mulf %117, %104 : vector<16x64xf32>
    %121 = arith.mulf %116, %118 : vector<16x64xf32>
    %122 = arith.addf %120, %121 : vector<16x64xf32>
    %123 = math.tanh %122 : vector<16x64xf32>
    %124 = arith.mulf %119, %123 : vector<16x64xf32>
    %125 = vector.extract_strided_slice %6 {offsets = [2, 0, 0], sizes = [1, 16, 64], strides = [1, 1, 1]} : vector<3x16x64xi1> to vector<1x16x64xi1>
    %126 = vector.shape_cast %125 : vector<1x16x64xi1> to vector<16x64xi1>
    %127 = arith.select %126, %124, %103 : vector<16x64xi1>, vector<16x64xf32>
    %128 = tpu.concatenate %36, %40, %127 in 1 : vector<16x32xf32>, vector<16x32xf32>, vector<16x64xf32> -> vector<16x128xf32>
    %c192 = arith.constant 192 : index
    %c0_42 = arith.constant 0 : index
    %129 = vector.load %arg7[%c192, %c0_42] : memref<544x128xbf16, #tpu.memory_space<vmem>>, vector<128x32xbf16>
    %130 = arith.truncf %128 : vector<16x128xf32> to vector<16x128xbf16>
    %cst_43 = arith.constant dense<0.000000e+00> : vector<16x32xf32>
    %131 = tpu.matmul %130, %129, %cst_43 {dimension_numbers = #tpu.dot_dimension_numbers<[1], [0], [0], [1], [0, 0, 1, 1], [], []>} : vector<16x128xbf16>, vector<128x32xbf16>, vector<16x32xf32> -> vector<16x32xf32>
    %c5 = arith.constant 5 : index
    %c0_44 = arith.constant 0 : index
    %132 = vector.load %arg8[%c5, %c0_44] : memref<16x256xf32, #tpu.memory_space<vmem>>, vector<1x32xf32>
    %133 = vector.broadcast %132 : vector<1x32xf32> to vector<16x32xf32>
    %134 = arith.addf %131, %133 : vector<16x32xf32>
    %cst_45 = arith.constant 0.333333343 : f32
    %135 = vector.broadcast %cst_45 : f32 to vector<16x32xf32>
    %136 = arith.mulf %134, %135 : vector<16x32xf32>
    %137 = arith.addf %136, %36 : vector<16x32xf32>
    %cst_46 = arith.constant dense<0.000000e+00> : vector<16xf32>
    %138 = vector.multi_reduction <add>, %137, %cst_46 [1] : vector<16x32xf32> to vector<16xf32>
    %139 = vector.shape_cast %138 : vector<16xf32> to vector<16x1xf32>
    %cst_47 = arith.constant 3.200000e+01 : f32
    %140 = vector.broadcast %cst_47 : f32 to vector<16x1xf32>
    %141 = arith.divf %139, %140 : vector<16x1xf32>
    %142 = vector.broadcast %141 : vector<16x1xf32> to vector<16x32xf32>
    %143 = arith.subf %137, %142 : vector<16x32xf32>
    %144 = arith.mulf %143, %143 : vector<16x32xf32>
    %cst_48 = arith.constant dense<0.000000e+00> : vector<16xf32>
    %145 = vector.multi_reduction <add>, %144, %cst_48 [1] : vector<16x32xf32> to vector<16xf32>
    %146 = vector.shape_cast %145 : vector<16xf32> to vector<16x1xf32>
    %cst_49 = arith.constant 3.200000e+01 : f32
    %147 = vector.broadcast %cst_49 : f32 to vector<16x1xf32>
    %148 = arith.divf %146, %147 : vector<16x1xf32>
    %149 = vector.broadcast %141 : vector<16x1xf32> to vector<16x32xf32>
    %150 = arith.subf %137, %149 : vector<16x32xf32>
    %cst_50 = arith.constant 9.99999974E-6 : f32
    %151 = vector.broadcast %cst_50 : f32 to vector<16x1xf32>
    %152 = arith.addf %148, %151 : vector<16x1xf32>
    %153 = math.rsqrt %152 : vector<16x1xf32>
    %154 = vector.broadcast %153 : vector<16x1xf32> to vector<16x32xf32>
    %155 = arith.mulf %150, %154 : vector<16x32xf32>
    %c7 = arith.constant 7 : index
    %c0_51 = arith.constant 0 : index
    %156 = vector.load %arg8[%c7, %c0_51] : memref<16x256xf32, #tpu.memory_space<vmem>>, vector<1x32xf32>
    %157 = vector.broadcast %156 : vector<1x32xf32> to vector<16x32xf32>
    %158 = arith.mulf %155, %157 : vector<16x32xf32>
    %c8 = arith.constant 8 : index
    %c0_52 = arith.constant 0 : index
    %159 = vector.load %arg8[%c8, %c0_52] : memref<16x256xf32, #tpu.memory_space<vmem>>, vector<1x32xf32>
    %160 = vector.broadcast %159 : vector<1x32xf32> to vector<16x32xf32>
    %161 = arith.addf %158, %160 : vector<16x32xf32>
    %cst_53 = arith.constant 0.000000e+00 : f32
    %162 = vector.broadcast %cst_53 : f32 to vector<16x32xf32>
    %163 = arith.maximumf %161, %162 : vector<16x32xf32>
    %164 = arith.truncf %163 : vector<16x32xf32> to vector<16x32xbf16>
    %cst_54 = arith.constant dense<0.000000e+00> : vector<16x32xf32>
    %165 = tpu.matmul %1, %164, %cst_54 {dimension_numbers = #tpu.dot_dimension_numbers<[1], [0], [0], [1], [0, 0, 1, 1], [], []>} : vector<16x16xbf16>, vector<16x32xbf16>, vector<16x32xf32> -> vector<16x32xf32>
    %166 = vector.broadcast %2 : vector<16x1xf32> to vector<16x32xf32>
    %167 = arith.mulf %165, %166 : vector<16x32xf32>
    %168 = arith.truncf %163 : vector<16x32xf32> to vector<16x32xbf16>
    %cst_55 = arith.constant dense<0.000000e+00> : vector<96x32xf32>
    %169 = tpu.matmul %3, %168, %cst_55 {dimension_numbers = #tpu.dot_dimension_numbers<[1], [0], [0], [1], [0, 0, 1, 1], [], []>} : vector<96x16xbf16>, vector<16x32xbf16>, vector<96x32xf32> -> vector<96x32xf32>
    %170 = vector.extract_strided_slice %169 {offsets = [0, 0], sizes = [48, 32], strides = [1, 1]} : vector<96x32xf32> to vector<48x32xf32>
    %171 = vector.extract_strided_slice %169 {offsets = [48, 0], sizes = [48, 32], strides = [1, 1]} : vector<96x32xf32> to vector<48x32xf32>
    %172 = tpu.concatenate %170, %171 in 1 : vector<48x32xf32>, vector<48x32xf32> -> vector<48x64xf32>
    %c2_56 = arith.constant 2 : index
    %c0_57 = arith.constant 0 : index
    %c0_58 = arith.constant 0 : index
    %173 = vector.load %arg6[%c2_56, %c0_57, %c0_58] : memref<4x64x256xbf16, #tpu.memory_space<vmem>>, vector<1x64x256xbf16>
    %174 = vector.shape_cast %173 : vector<1x64x256xbf16> to vector<64x256xbf16>
    %175 = arith.truncf %172 : vector<48x64xf32> to vector<48x64xbf16>
    %cst_59 = arith.constant dense<0.000000e+00> : vector<48x256xf32>
    %176 = tpu.matmul %175, %174, %cst_59 {dimension_numbers = #tpu.dot_dimension_numbers<[1], [0], [0], [1], [0, 0, 1, 1], [], []>} : vector<48x64xbf16>, vector<64x256xbf16>, vector<48x256xf32> -> vector<48x256xf32>
    %c1_60 = arith.constant 1 : index
    %c0_61 = arith.constant 0 : index
    %177 = vector.load %arg8[%c1_60, %c0_61] : memref<16x256xf32, #tpu.memory_space<vmem>>, vector<1x256xf32>
    %178 = vector.broadcast %177 : vector<1x256xf32> to vector<48x256xf32>
    %179 = arith.addf %176, %178 : vector<48x256xf32>
    %c3_62 = arith.constant 3 : index
    %c0_63 = arith.constant 0 : index
    %c0_64 = arith.constant 0 : index
    %180 = vector.load %arg6[%c3_62, %c0_63, %c0_64] : memref<4x64x256xbf16, #tpu.memory_space<vmem>>, vector<1x64x256xbf16>
    %181 = vector.shape_cast %180 : vector<1x64x256xbf16> to vector<64x256xbf16>
    %cst_65 = arith.constant 0.000000e+00 : f32
    %182 = vector.broadcast %cst_65 : f32 to vector<16x64xf32>
    %cst_66 = arith.constant 0.000000e+00 : f32
    %183 = vector.broadcast %cst_66 : f32 to vector<16x64xf32>
    %184 = vector.extract_strided_slice %179 {offsets = [0, 0], sizes = [16, 256], strides = [1, 1]} : vector<48x256xf32> to vector<16x256xf32>
    %185 = arith.truncf %182 : vector<16x64xf32> to vector<16x64xbf16>
    %cst_67 = arith.constant dense<0.000000e+00> : vector<16x256xf32>
    %186 = tpu.matmul %185, %181, %cst_67 {dimension_numbers = #tpu.dot_dimension_numbers<[1], [0], [0], [1], [0, 0, 1, 1], [], []>} : vector<16x64xbf16>, vector<64x256xbf16>, vector<16x256xf32> -> vector<16x256xf32>
    %187 = arith.addf %184, %186 : vector<16x256xf32>
    %188 = math.tanh %187 : vector<16x256xf32>
    %189 = arith.negf %187 : vector<16x256xf32>
    %190 = math.exp %189 : vector<16x256xf32>
    %cst_68 = arith.constant 1.000000e+00 : f32
    %191 = vector.broadcast %cst_68 : f32 to vector<16x256xf32>
    %192 = arith.addf %191, %190 : vector<16x256xf32>
    %193 = arith.divf %191, %192 : vector<16x256xf32>
    %194 = arith.select %12, %188, %193 : vector<16x256xi1>, vector<16x256xf32>
    %195 = vector.extract_strided_slice %194 {offsets = [0, 0], sizes = [16, 64], strides = [1, 1]} : vector<16x256xf32> to vector<16x64xf32>
    %196 = vector.extract_strided_slice %194 {offsets = [0, 64], sizes = [16, 64], strides = [1, 1]} : vector<16x256xf32> to vector<16x64xf32>
    %197 = vector.extract_strided_slice %194 {offsets = [0, 128], sizes = [16, 64], strides = [1, 1]} : vector<16x256xf32> to vector<16x64xf32>
    %198 = vector.extract_strided_slice %194 {offsets = [0, 192], sizes = [16, 64], strides = [1, 1]} : vector<16x256xf32> to vector<16x64xf32>
    %199 = arith.mulf %196, %183 : vector<16x64xf32>
    %200 = arith.mulf %195, %197 : vector<16x64xf32>
    %201 = arith.addf %199, %200 : vector<16x64xf32>
    %202 = math.tanh %201 : vector<16x64xf32>
    %203 = arith.mulf %198, %202 : vector<16x64xf32>
    %204 = vector.extract_strided_slice %6 {offsets = [0, 0, 0], sizes = [1, 16, 64], strides = [1, 1, 1]} : vector<3x16x64xi1> to vector<1x16x64xi1>
    %205 = vector.shape_cast %204 : vector<1x16x64xi1> to vector<16x64xi1>
    %206 = arith.select %205, %203, %182 : vector<16x64xi1>, vector<16x64xf32>
    %207 = arith.select %205, %201, %183 : vector<16x64xi1>, vector<16x64xf32>
    %208 = vector.extract_strided_slice %179 {offsets = [16, 0], sizes = [16, 256], strides = [1, 1]} : vector<48x256xf32> to vector<16x256xf32>
    %209 = arith.truncf %206 : vector<16x64xf32> to vector<16x64xbf16>
    %cst_69 = arith.constant dense<0.000000e+00> : vector<16x256xf32>
    %210 = tpu.matmul %209, %181, %cst_69 {dimension_numbers = #tpu.dot_dimension_numbers<[1], [0], [0], [1], [0, 0, 1, 1], [], []>} : vector<16x64xbf16>, vector<64x256xbf16>, vector<16x256xf32> -> vector<16x256xf32>
    %211 = arith.addf %208, %210 : vector<16x256xf32>
    %212 = math.tanh %211 : vector<16x256xf32>
    %213 = arith.negf %211 : vector<16x256xf32>
    %214 = math.exp %213 : vector<16x256xf32>
    %cst_70 = arith.constant 1.000000e+00 : f32
    %215 = vector.broadcast %cst_70 : f32 to vector<16x256xf32>
    %216 = arith.addf %215, %214 : vector<16x256xf32>
    %217 = arith.divf %215, %216 : vector<16x256xf32>
    %218 = arith.select %12, %212, %217 : vector<16x256xi1>, vector<16x256xf32>
    %219 = vector.extract_strided_slice %218 {offsets = [0, 0], sizes = [16, 64], strides = [1, 1]} : vector<16x256xf32> to vector<16x64xf32>
    %220 = vector.extract_strided_slice %218 {offsets = [0, 64], sizes = [16, 64], strides = [1, 1]} : vector<16x256xf32> to vector<16x64xf32>
    %221 = vector.extract_strided_slice %218 {offsets = [0, 128], sizes = [16, 64], strides = [1, 1]} : vector<16x256xf32> to vector<16x64xf32>
    %222 = vector.extract_strided_slice %218 {offsets = [0, 192], sizes = [16, 64], strides = [1, 1]} : vector<16x256xf32> to vector<16x64xf32>
    %223 = arith.mulf %220, %207 : vector<16x64xf32>
    %224 = arith.mulf %219, %221 : vector<16x64xf32>
    %225 = arith.addf %223, %224 : vector<16x64xf32>
    %226 = math.tanh %225 : vector<16x64xf32>
    %227 = arith.mulf %222, %226 : vector<16x64xf32>
    %228 = vector.extract_strided_slice %6 {offsets = [1, 0, 0], sizes = [1, 16, 64], strides = [1, 1, 1]} : vector<3x16x64xi1> to vector<1x16x64xi1>
    %229 = vector.shape_cast %228 : vector<1x16x64xi1> to vector<16x64xi1>
    %230 = arith.select %229, %227, %206 : vector<16x64xi1>, vector<16x64xf32>
    %231 = arith.select %229, %225, %207 : vector<16x64xi1>, vector<16x64xf32>
    %232 = vector.extract_strided_slice %179 {offsets = [32, 0], sizes = [16, 256], strides = [1, 1]} : vector<48x256xf32> to vector<16x256xf32>
    %233 = arith.truncf %230 : vector<16x64xf32> to vector<16x64xbf16>
    %cst_71 = arith.constant dense<0.000000e+00> : vector<16x256xf32>
    %234 = tpu.matmul %233, %181, %cst_71 {dimension_numbers = #tpu.dot_dimension_numbers<[1], [0], [0], [1], [0, 0, 1, 1], [], []>} : vector<16x64xbf16>, vector<64x256xbf16>, vector<16x256xf32> -> vector<16x256xf32>
    %235 = arith.addf %232, %234 : vector<16x256xf32>
    %236 = math.tanh %235 : vector<16x256xf32>
    %237 = arith.negf %235 : vector<16x256xf32>
    %238 = math.exp %237 : vector<16x256xf32>
    %cst_72 = arith.constant 1.000000e+00 : f32
    %239 = vector.broadcast %cst_72 : f32 to vector<16x256xf32>
    %240 = arith.addf %239, %238 : vector<16x256xf32>
    %241 = arith.divf %239, %240 : vector<16x256xf32>
    %242 = arith.select %12, %236, %241 : vector<16x256xi1>, vector<16x256xf32>
    %243 = vector.extract_strided_slice %242 {offsets = [0, 0], sizes = [16, 64], strides = [1, 1]} : vector<16x256xf32> to vector<16x64xf32>
    %244 = vector.extract_strided_slice %242 {offsets = [0, 64], sizes = [16, 64], strides = [1, 1]} : vector<16x256xf32> to vector<16x64xf32>
    %245 = vector.extract_strided_slice %242 {offsets = [0, 128], sizes = [16, 64], strides = [1, 1]} : vector<16x256xf32> to vector<16x64xf32>
    %246 = vector.extract_strided_slice %242 {offsets = [0, 192], sizes = [16, 64], strides = [1, 1]} : vector<16x256xf32> to vector<16x64xf32>
    %247 = arith.mulf %244, %231 : vector<16x64xf32>
    %248 = arith.mulf %243, %245 : vector<16x64xf32>
    %249 = arith.addf %247, %248 : vector<16x64xf32>
    %250 = math.tanh %249 : vector<16x64xf32>
    %251 = arith.mulf %246, %250 : vector<16x64xf32>
    %252 = vector.extract_strided_slice %6 {offsets = [2, 0, 0], sizes = [1, 16, 64], strides = [1, 1, 1]} : vector<3x16x64xi1> to vector<1x16x64xi1>
    %253 = vector.shape_cast %252 : vector<1x16x64xi1> to vector<16x64xi1>
    %254 = arith.select %253, %251, %230 : vector<16x64xi1>, vector<16x64xf32>
    %255 = tpu.concatenate %163, %167, %254 in 1 : vector<16x32xf32>, vector<16x32xf32>, vector<16x64xf32> -> vector<16x128xf32>
    %c320 = arith.constant 320 : index
    %c0_73 = arith.constant 0 : index
    %256 = vector.load %arg7[%c320, %c0_73] : memref<544x128xbf16, #tpu.memory_space<vmem>>, vector<128x32xbf16>
    %257 = arith.truncf %255 : vector<16x128xf32> to vector<16x128xbf16>
    %cst_74 = arith.constant dense<0.000000e+00> : vector<16x32xf32>
    %258 = tpu.matmul %257, %256, %cst_74 {dimension_numbers = #tpu.dot_dimension_numbers<[1], [0], [0], [1], [0, 0, 1, 1], [], []>} : vector<16x128xbf16>, vector<128x32xbf16>, vector<16x32xf32> -> vector<16x32xf32>
    %c6 = arith.constant 6 : index
    %c0_75 = arith.constant 0 : index
    %259 = vector.load %arg8[%c6, %c0_75] : memref<16x256xf32, #tpu.memory_space<vmem>>, vector<1x32xf32>
    %260 = vector.broadcast %259 : vector<1x32xf32> to vector<16x32xf32>
    %261 = arith.addf %258, %260 : vector<16x32xf32>
    %cst_76 = arith.constant 0.333333343 : f32
    %262 = vector.broadcast %cst_76 : f32 to vector<16x32xf32>
    %263 = arith.mulf %261, %262 : vector<16x32xf32>
    %264 = arith.addf %263, %163 : vector<16x32xf32>
    %cst_77 = arith.constant dense<0.000000e+00> : vector<16xf32>
    %265 = vector.multi_reduction <add>, %264, %cst_77 [1] : vector<16x32xf32> to vector<16xf32>
    %266 = vector.shape_cast %265 : vector<16xf32> to vector<16x1xf32>
    %cst_78 = arith.constant 3.200000e+01 : f32
    %267 = vector.broadcast %cst_78 : f32 to vector<16x1xf32>
    %268 = arith.divf %266, %267 : vector<16x1xf32>
    %269 = vector.broadcast %268 : vector<16x1xf32> to vector<16x32xf32>
    %270 = arith.subf %264, %269 : vector<16x32xf32>
    %271 = arith.mulf %270, %270 : vector<16x32xf32>
    %cst_79 = arith.constant dense<0.000000e+00> : vector<16xf32>
    %272 = vector.multi_reduction <add>, %271, %cst_79 [1] : vector<16x32xf32> to vector<16xf32>
    %273 = vector.shape_cast %272 : vector<16xf32> to vector<16x1xf32>
    %cst_80 = arith.constant 3.200000e+01 : f32
    %274 = vector.broadcast %cst_80 : f32 to vector<16x1xf32>
    %275 = arith.divf %273, %274 : vector<16x1xf32>
    %276 = vector.broadcast %268 : vector<16x1xf32> to vector<16x32xf32>
    %277 = arith.subf %264, %276 : vector<16x32xf32>
    %cst_81 = arith.constant 9.99999974E-6 : f32
    %278 = vector.broadcast %cst_81 : f32 to vector<16x1xf32>
    %279 = arith.addf %275, %278 : vector<16x1xf32>
    %280 = math.rsqrt %279 : vector<16x1xf32>
    %281 = vector.broadcast %280 : vector<16x1xf32> to vector<16x32xf32>
    %282 = arith.mulf %277, %281 : vector<16x32xf32>
    %c9 = arith.constant 9 : index
    %c0_82 = arith.constant 0 : index
    %283 = vector.load %arg8[%c9, %c0_82] : memref<16x256xf32, #tpu.memory_space<vmem>>, vector<1x32xf32>
    %284 = vector.broadcast %283 : vector<1x32xf32> to vector<16x32xf32>
    %285 = arith.mulf %282, %284 : vector<16x32xf32>
    %c10 = arith.constant 10 : index
    %c0_83 = arith.constant 0 : index
    %286 = vector.load %arg8[%c10, %c0_83] : memref<16x256xf32, #tpu.memory_space<vmem>>, vector<1x32xf32>
    %287 = vector.broadcast %286 : vector<1x32xf32> to vector<16x32xf32>
    %288 = arith.addf %285, %287 : vector<16x32xf32>
    %cst_84 = arith.constant 0.000000e+00 : f32
    %289 = vector.broadcast %cst_84 : f32 to vector<16x32xf32>
    %290 = arith.maximumf %288, %289 : vector<16x32xf32>
    %291 = vector.extract_strided_slice %290 {offsets = [0, 0], sizes = [8, 32], strides = [1, 1]} : vector<16x32xf32> to vector<8x32xf32>
    %cst_85 = arith.constant dense<0xFF800000> : vector<32xf32>
    %292 = vector.multi_reduction <maximumf>, %291, %cst_85 [0] : vector<8x32xf32> to vector<32xf32>
    %293 = vector.shape_cast %292 : vector<32xf32> to vector<1x32xf32>
    %294 = vector.extract_strided_slice %290 {offsets = [8, 0], sizes = [8, 32], strides = [1, 1]} : vector<16x32xf32> to vector<8x32xf32>
    %cst_86 = arith.constant dense<0xFF800000> : vector<32xf32>
    %295 = vector.multi_reduction <maximumf>, %294, %cst_86 [0] : vector<8x32xf32> to vector<32xf32>
    %296 = vector.shape_cast %295 : vector<32xf32> to vector<1x32xf32>
    %297 = tpu.concatenate %293, %296 in 0 : vector<1x32xf32>, vector<1x32xf32> -> vector<2x32xf32>
    %c448 = arith.constant 448 : index
    %c0_87 = arith.constant 0 : index
    %298 = vector.load %arg7[%c448, %c0_87] : memref<544x128xbf16, #tpu.memory_space<vmem>>, vector<32x32xbf16>
    %299 = arith.truncf %297 : vector<2x32xf32> to vector<2x32xbf16>
    %cst_88 = arith.constant dense<0.000000e+00> : vector<2x32xf32>
    %300 = tpu.matmul %299, %298, %cst_88 {dimension_numbers = #tpu.dot_dimension_numbers<[1], [0], [0], [1], [0, 0, 1, 1], [], []>} : vector<2x32xbf16>, vector<32x32xbf16>, vector<2x32xf32> -> vector<2x32xf32>
    %c11 = arith.constant 11 : index
    %c0_89 = arith.constant 0 : index
    %301 = vector.load %arg8[%c11, %c0_89] : memref<16x256xf32, #tpu.memory_space<vmem>>, vector<1x32xf32>
    %302 = vector.broadcast %301 : vector<1x32xf32> to vector<2x32xf32>
    %303 = arith.addf %300, %302 : vector<2x32xf32>
    %cst_90 = arith.constant 0.000000e+00 : f32
    %304 = vector.broadcast %cst_90 : f32 to vector<2x32xf32>
    %305 = arith.maximumf %303, %304 : vector<2x32xf32>
    %c480 = arith.constant 480 : index
    %c0_91 = arith.constant 0 : index
    %306 = vector.load %arg7[%c480, %c0_91] : memref<544x128xbf16, #tpu.memory_space<vmem>>, vector<32x32xbf16>
    %307 = arith.truncf %305 : vector<2x32xf32> to vector<2x32xbf16>
    %cst_92 = arith.constant dense<0.000000e+00> : vector<2x32xf32>
    %308 = tpu.matmul %307, %306, %cst_92 {dimension_numbers = #tpu.dot_dimension_numbers<[1], [0], [0], [1], [0, 0, 1, 1], [], []>} : vector<2x32xbf16>, vector<32x32xbf16>, vector<2x32xf32> -> vector<2x32xf32>
    %c12 = arith.constant 12 : index
    %c0_93 = arith.constant 0 : index
    %309 = vector.load %arg8[%c12, %c0_93] : memref<16x256xf32, #tpu.memory_space<vmem>>, vector<1x32xf32>
    %310 = vector.broadcast %309 : vector<1x32xf32> to vector<2x32xf32>
    %311 = arith.addf %308, %310 : vector<2x32xf32>
    %cst_94 = arith.constant 0.000000e+00 : f32
    %312 = vector.broadcast %cst_94 : f32 to vector<2x32xf32>
    %313 = arith.maximumf %311, %312 : vector<2x32xf32>
    %c512 = arith.constant 512 : index
    %c0_95 = arith.constant 0 : index
    %314 = vector.load %arg7[%c512, %c0_95] : memref<544x128xbf16, #tpu.memory_space<vmem>>, vector<32x128xbf16>
    %315 = arith.truncf %313 : vector<2x32xf32> to vector<2x32xbf16>
    %cst_96 = arith.constant dense<0.000000e+00> : vector<2x128xf32>
    %316 = tpu.matmul %315, %314, %cst_96 {dimension_numbers = #tpu.dot_dimension_numbers<[1], [0], [0], [1], [0, 0, 1, 1], [], []>} : vector<2x32xbf16>, vector<32x128xbf16>, vector<2x128xf32> -> vector<2x128xf32>
    %c13 = arith.constant 13 : index
    %c0_97 = arith.constant 0 : index
    %317 = vector.load %arg8[%c13, %c0_97] : memref<16x256xf32, #tpu.memory_space<vmem>>, vector<1x128xf32>
    %318 = vector.broadcast %317 : vector<1x128xf32> to vector<2x128xf32>
    %319 = arith.addf %316, %318 : vector<2x128xf32>
    %c0_98 = arith.constant 0 : index
    %c0_99 = arith.constant 0 : index
    %320 = vector.load %arg9[%c0_98, %c0_99] : memref<2x128xf32, #tpu.memory_space<vmem>>, vector<2x128xf32>
    tpu.vector_store %arg9[%c0_98, %c0_99], %319 {strides = array<i32>} : memref<2x128xf32, #tpu.memory_space<vmem>>, vector<2x128xf32>,
    return
  }
  func.func @transform_0(%arg0: i32) -> (i32, i32) {
    %c0_i32 = arith.constant 0 : i32
    %c0_i32_0 = arith.constant 0 : i32
    %c0_i32_1 = arith.constant 0 : i32
    return %c0_i32, %c0_i32_0 : i32, i32
  }
  func.func @transform_1(%arg0: i32) -> (i32, i32) {
    %c0_i32 = arith.constant 0 : i32
    %c0_i32_0 = arith.constant 0 : i32
    %c0_i32_1 = arith.constant 0 : i32
    return %c0_i32, %c0_i32_0 : i32, i32
  }
  func.func @transform_2(%arg0: i32) -> (i32, i32) {
    %c0_i32 = arith.constant 0 : i32
    %c0_i32_0 = arith.constant 0 : i32
    %c0_i32_1 = arith.constant 0 : i32
    return %c0_i32, %c0_i32_0 : i32, i32
  }
  func.func @transform_3(%arg0: i32) -> (i32, i32) {
    %c0_i32 = arith.constant 0 : i32
    %c0_i32_0 = arith.constant 0 : i32
    %c0_i32_1 = arith.constant 0 : i32
    return %c0_i32, %c0_i32_0 : i32, i32
  }
  func.func @transform_4(%arg0: i32) -> (i32, i32, i32) {
    %c0_i32 = arith.constant 0 : i32
    %c0_i32_0 = arith.constant 0 : i32
    %c0_i32_1 = arith.constant 0 : i32
    %c0_i32_2 = arith.constant 0 : i32
    return %c0_i32, %c0_i32_0, %c0_i32_1 : i32, i32, i32
  }
  func.func @transform_5(%arg0: i32) -> (i32, i32, i32) {
    %c0_i32 = arith.constant 0 : i32
    %c0_i32_0 = arith.constant 0 : i32
    %c0_i32_1 = arith.constant 0 : i32
    %c0_i32_2 = arith.constant 0 : i32
    return %c0_i32, %c0_i32_0, %c0_i32_1 : i32, i32, i32
  }
  func.func @transform_6(%arg0: i32) -> (i32, i32) {
    %c0_i32 = arith.constant 0 : i32
    %c0_i32_0 = arith.constant 0 : i32
    %c0_i32_1 = arith.constant 0 : i32
    return %c0_i32, %c0_i32_0 : i32, i32
  }
  func.func @transform_7(%arg0: i32) -> (i32, i32) {
    %c0_i32 = arith.constant 0 : i32
    %c0_i32_0 = arith.constant 0 : i32
    %c0_i32_1 = arith.constant 0 : i32
    return %c0_i32, %c0_i32_0 : i32, i32
  }
  func.func @transform_8(%arg0: i32) -> (i32, i32) {
    %c0_i32 = arith.constant 0 : i32
    %c0_i32_0 = arith.constant 0 : i32
    %c0_i32_1 = arith.constant 0 : i32
    return %c0_i32, %c0_i32_0 : i32, i32
  }
}

</mosaic_0001>

<bundles_post_ra>
// kernel: tpu_custom_call.1
= control target key start
LH: loop header
LB: loop body
LE: loop exit
PB: predicated region body
PF: predicated region fallthrough
CT: control target
= control target key end

     0   :  { %13 = vsyncpa [#allocation3], 0  ;;  %s3655_s0 = inlined_call_operand.vmem [shape: bf16[16,32], index: 0, kind: input, shape index: {}]   ;;  %s3656_s1 = inlined_call_operand.vmem [shape: bf16[16,16], index: 1, kind: input, shape index: {}]   ;;  %s3657_s2 = inlined_call_operand.vmem [shape: f32[16,1], index: 2, kind: input, shape index: {}]   ;;  %s3658_s3 = inlined_call_operand.vmem [shape: bf16[96,16], index: 3, kind: input, shape index: {}]   ;;  %s3659_s4 = inlined_call_operand.vmem [shape: f32[3,16,64], index: 4, kind: input, shape index: {}]   ;;  %s3660_s5 = inlined_call_operand.hbm [shape: bf16[4,64,256], index: 5, kind: input, shape index: {}]   ;;  %s3661_s6 = inlined_call_operand.hbm [shape: bf16[544,128], index: 6, kind: input, shape index: {}]   ;;  %s3662_s7 = inlined_call_operand.hbm [shape: f32[16,256], index: 7, kind: input, shape index: {}]   ;;  %s3663_s8 = inlined_call_operand.hbm [shape: f32[2,128], index: 8, kind: output, shape index: {}]  }
   0x1   :  { %14 = vsyncpa [#allocation6], 0  ;;  %s43_s29 = sshll.u32 %s3661_s6, 4  ;;  %s44_s29 = int_to_ptr.hbm [resolvable:$true] %s43_s29 }
   0x2   :  { %15 = vsyncpa [#allocation4], 0  ;;  %s3072_s30 = smov [#allocation5]   ;;  %s30_s12 = sshll.u32 %s3660_s5, 4  ;;  %s31_s12 = int_to_ptr.hbm [resolvable:$true] %s30_s12 }
   0x3   :  { %s45_s9 = sshll.u32 %s3072_s30, 4  ;;  %s3073_s13 = smov 64   ;;  %s46_s9 = int_to_ptr.vmem [resolvable:$true] %s45_s9 }
   0x4   :  { %s3074_s14 = smov 4   ;;  %s3075_s15 = smov [#allocation2]  }
   0x5   :  { %51 = dma.hbm_to_vmem [thread:$0]  %s44_s29, 4352, %s46_s9, [#allocation6], %s3073_s13, %s3073_s13, %s3074_s14  }
   0x6   :  { %s32_s16 = sshll.u32 %s3075_s15, 4  ;;  %s3076_s17 = smov 128   ;;  %s33_s16 = int_to_ptr.vmem [resolvable:$true] %s32_s16 }
   0x7   :  { %s3077_s6 = smov 8   ;;  %s56_s20 = sshll.u32 %s3662_s7, 4  ;;  %s57_s20 = int_to_ptr.hbm [resolvable:$true] %s56_s20 }
   0x8   :  { %38 = dma.hbm_to_vmem [thread:$0]  %s31_s12, 4096, %s33_s16, [#allocation3], %s3076_s17, %s3076_s17, %s3077_s6  }
   0x9   :  { %s3078_s21 = smov [#allocation7]   ;;  %s3079_s5 = smov 256  }
   0xa   :  { %s58_s22 = sshll.u32 %s3078_s21, 4  ;;  %s3080_s23 = smov 16   ;;  %s59_s22 = int_to_ptr.vmem [resolvable:$true] %s58_s22 }
   0xb   :  { %64 = dma.hbm_to_vmem [thread:$0]  %s57_s20, 512, %s59_s22, [#allocation6], %s3079_s5, %s3079_s5, %s3080_s23  }
   0xc   :  { %3066 = dma.done.wait [#allocation3], 4096  }
   0xd   :  { %3067 = vsyncadd [#allocation3], 4294963200 }
   0xe   :  { %3068 = dma.done.wait [#allocation6], 4864  }
   0xf   :  { %3069 = vsyncadd [#allocation6], 4294962432  ;;  %v2648_v0 = vld [vmem:[#allocation5 + $0x8] sm:$0xff]  ;;  %v2647_v2 = vld [vmem:[#allocation5] sm:$0xff]  ;;  %vm138_vm0 = vcmask 261120   ;;  %vm190_vm1 = vcmask 523264  }
  0x10   :  { %v2652_v1 = vld [vmem:[#allocation5 + $0x28] sm:$0xff]  ;;  %148 = vmatpush.bf16.msra.mxu0 %v2648_v0  ;;  %v2639_v3 = vld [vmem:[%s3655_s0] sm:$0xff]  ;;  %v2650_v5 = vld [vmem:[#allocation5 + $0x18] sm:$0xff]  ;;  %vm304_vm2 = vcmask 130048   ;;  %s3081_s15 = smov 32   ;;  %v3082_v59 = vmov 0  }
  0x11   :  { %198 = vmatpush.bf16.msra.mxu1 %v2652_v1  ;;  %v2651_v4 = vld [vmem:[#allocation5 + $0x20] sm:$0xff]  ;;  %v2649_v6 = vld [vmem:[#allocation5 + $0x10] sm:$0xff]  ;;  %v2656_v10 = vld [vmem:[#allocation5 + $0x48] sm:$0xff]  ;;  %2751 = vset.pattern.permute.xlu1 %v3082_v59  ;;  %s2267_s21 = sshll.u32 %s3663_s8, 4  ;;  %s2268_s21 = int_to_ptr.hbm [resolvable:$true] %s2267_s21 }
  0x12   :  { %251 = vmatpush.bf16.msra.mxu2 %v2656_v10  ;;  %v2655_v11 = vld [vmem:[#allocation5 + $0x40] sm:$0xff]  ;;  %v2654_v12 = vld [vmem:[#allocation5 + $0x38] sm:$0xff]  ;;  %v2653_v13 = vld [vmem:[#allocation5 + $0x30] sm:$0xff]  ;;  %2752 = vset.pattern.permute.xlu2 %v3082_v59 }
  0x13   :  { %v165_v15 = vld [vmem:[#allocation7 + $0x2] ss:$0 sm:$0xff]  ;;  %v2658_v22 = vld [vmem:[#allocation5 + $0x58] sm:$0xff]  ;;  %v219_v25 = vld [vmem:[#allocation7 + $0x3] ss:$0 sm:$0xff]  ;;  %2808 = vset.pattern.permute.xlu0 %v3082_v59 }
  0x14   :  { %149 = vmatpush.bf16.msra.mxu0 %v2647_v2  ;;  %290 = vmatpush.bf16.msra.mxu3 %v2658_v22  ;;  %v2657_v23 = vld [vmem:[#allocation5 + $0x50] sm:$0xff]  ;;  %v2641_v38 = vld [vmem:[%s3658_s3] sm:$0xff]  ;;  %v2642_v39 = vld [vmem:[%s3658_s3 + $0x8] sm:$0xff] }
  0x15   :  { %199 = vmatpush.bf16.msra.mxu1 %v2651_v4  ;;  %v268_v33 = vld [vmem:[#allocation7 + $0x4] ss:$0 sm:$0xff]  ;;  %v2644_v41 = vld [vmem:[%s3658_s3 + $0x18] sm:$0xff]  ;;  %v2645_v42 = vld [vmem:[%s3658_s3 + $0x20] sm:$0xff] }
  0x16   :  { %252 = vmatpush.bf16.msra.mxu2 %v2655_v11  ;;  %v2643_v40 = vld [vmem:[%s3658_s3 + $0x10] sm:$0xff]  ;;  %v2646_v43 = vld [vmem:[%s3658_s3 + $0x28] sm:$0xff]  ;;  %v2640_v53 = vld [vmem:[%s3656_s1] sm:$0xff] }
  0x17   :  { %2290 = vmatmul.msk.bf16.vlgmr.msra.gmra.mxu0 %vm138_vm0, %v2639_v3  ;;  %v2433_v54 = vld [vmem:[#allocation2 + $0x70] sm:$0xf]  ;;  %v2674_v55 = vld [vmem:[#allocation2 + $0x74] sm:$0xf0]  ;;  %v2425_v57 = vld [vmem:[#allocation2 + $0x60] sm:$0xf] }
  0x18   :  { %291 = vmatpush.bf16.msra.mxu3 %v2657_v23  ;;  %v3194_v56 = vor.u32 %v2674_v55, %v2433_v54  ;;  %v2672_v58 = vld [vmem:[#allocation2 + $0x64] sm:$0xf0]  ;;  %v2395_v61 = vld [vmem:[#allocation2 + $0x30] sm:$0xf]  ;;  %v2666_v62 = vld [vmem:[#allocation2 + $0x34] sm:$0xf0] }
  0x19   :  { %200 = vmatpush.bf16.msra.mxu1 %v2650_v5  ;;  %v3201_v60 = vor.u32 %v2672_v58, %v2425_v57  ;;  %v2665_v63 = vld [vmem:[#allocation2 + $0x34] sm:$0xf]  ;;  %v2417_v0 = vld [vmem:[#allocation2 + $0x50] sm:$0xf]  ;;  %v2670_v1 = vld [vmem:[#allocation2 + $0x54] sm:$0xf0]  ;;  %v2396_v2 = vor.u32 %v2666_v62, %v2395_v61 }
  0x1a   :  { %253 = vmatpush.bf16.msra.mxu2 %v2654_v12  ;;  %v2397_v3 = vld [vmem:[#allocation2 + $0x38] sm:$0xf0]  ;;  %v2389_v10 = vld [vmem:[#allocation2 + $0x28] sm:$0xf0]  ;;  %v2418_v11 = vor.u32 %v2670_v1, %v2417_v0  ;;  %v2409_v12 = vld [vmem:[#allocation2 + $0x40] sm:$0xf] }
  0x1b   :  { %v2400_v5 = vor.u32 %v2665_v63, %v2397_v3  ;;  %v462_v63 = vld [vmem:[#allocation7] ss:$8 sm:$0x3] }
  0x1c   :  { %v3227_v1 = vperm.slane %v462_v63, 0 }
  0x1d   :  { %201 = vmatpush.bf16.msra.mxu1 %v2649_v6  ;;  %v2387_v6 = vld [vmem:[#allocation2 + $0x20] sm:$0xf] }
  0x1e   :  { %254 = vmatpush.bf16.msra.mxu2 %v2653_v13 }
  0x21   :  { %521 = vmatpush.bf16.msrb.mxu1 %v2396_v2 }
  0x22   :  { %545 = vmatpush.bf16.msrb.mxu2 %v2400_v5  ;;  %v3230_v5 = vperm.slane %v462_v63, 1 }
  0x94   :  { %v151_v7 = vpop.f32.mrf.mxu0 }
  0x9c   :  { %v153_v8 = vpop.f32.mrf.mxu0 }
  0x9d   :  { %v164_v9 = vpack.c.bf16 %v153_v8, %v151_v7  ;;  %v2664_v7 = vld [vmem:[#allocation2 + $0x24] sm:$0xf0]  ;;  %v2663_v8 = vld [vmem:[#allocation2 + $0x24] sm:$0xf] }
  0x9e   :  { %v2392_v13 = vor.u32 %v2663_v8, %v2389_v10 }
  0x9f   :  { %2307 = vmatmul.msk.bf16.vlgmr.msra.gmra.mxu1 %vm190_vm1, %v164_v9  ;;  %v2388_v9 = vor.u32 %v2664_v7, %v2387_v6 }
  0xa0   :  { %546 = vmatpush.bf16.msrb.mxu2 %v2392_v13 }
  0xa1   :  { %522 = vmatpush.bf16.msrb.mxu1 %v2388_v9 }
 0x11c   :  { %v203_v14 = vpop.f32.mrf.mxu1 }
 0x11d   :  { %v204_v16 = vadd.f32 %v203_v14, %v165_v15  ;;  %v2379_v14 = vld [vmem:[#allocation2 + $0x10] sm:$0xf] }
 0x11f   :  { %v208_v19 = vmax.f32 %v204_v16, 0.0  ;;  %v2668_v16 = vld [vmem:[#allocation2 + $0x44] sm:$0xf0] }
 0x120   :  { %v2410_v22 = vor.u32 %v2668_v16, %v2409_v12 }
 0x124   :  { %v205_v17 = vpop.f32.mrf.mxu1 }
 0x125   :  { %v206_v18 = vadd.f32 %v205_v17, %v165_v15  ;;  %v2662_v15 = vld [vmem:[#allocation2 + $0x14] sm:$0xf0]  ;;  %v2661_v17 = vld [vmem:[#allocation2 + $0x14] sm:$0xf] }
 0x127   :  { %v209_v20 = vmax.f32 %v206_v18, 0.0  ;;  %v2381_v18 = vld [vmem:[#allocation2 + $0x18] sm:$0xf0] }
 0x128   :  { %v2384_v23 = vor.u32 %v2661_v17, %v2381_v18 }
 0x129   :  { %v218_v21 = vpack.c.bf16 %v209_v20, %v208_v19  ;;  %v2673_v19 = vld [vmem:[#allocation2 + $0x74] sm:$0xf]  ;;  %v2435_v20 = vld [vmem:[#allocation2 + $0x78] sm:$0xf0] }
 0x12a   :  { %547 = vmatpush.bf16.msrb.mxu2 %v2384_v23 }
 0x12b   :  { %2324 = vmatmul.msk.bf16.vlgmr.msra.gmra.mxu2 %vm190_vm1, %v218_v21  ;;  %v2380_v21 = vor.u32 %v2662_v15, %v2379_v14 }
 0x12d   :  { %523 = vmatpush.bf16.msrb.mxu1 %v2380_v21 }
 0x1ae   :  { %v256_v24 = vpop.f32.mrf.mxu2 }
 0x1af   :  { %v257_v26 = vadd.f32 %v256_v24, %v219_v25  ;;  %v2438_v24 = vor.u32 %v2673_v19, %v2435_v20 }
 0x1b1   :  { %v261_v29 = vmax.f32 %v257_v26, 0.0  ;;  %v2671_v26 = vld [vmem:[#allocation2 + $0x64] sm:$0xf] }
 0x1b6   :  { %v258_v27 = vpop.f32.mrf.mxu2 }
 0x1b7   :  { %v259_v28 = vadd.f32 %v258_v27, %v219_v25  ;;  %v2427_v27 = vld [vmem:[#allocation2 + $0x68] sm:$0xf0] }
 0x1b9   :  { %v262_v30 = vmax.f32 %v259_v28, 0.0 }
 0x1bb   :  { %v267_v31 = vpack.c.bf16 %v262_v30, %v261_v29  ;;  %v2430_v29 = vor.u32 %v2671_v26, %v2427_v27  ;;  %v2669_v30 = vld [vmem:[#allocation2 + $0x54] sm:$0xf] }
 0x1bd   :  { %2333 = vmatmul.msk.bf16.vlgmr.msra.gmra.mxu3 %vm138_vm0, %v267_v31  ;;  %v2419_v31 = vld [vmem:[#allocation2 + $0x58] sm:$0xf0] }
 0x240   :  { %v293_v32 = vpop.f32.mrf.mxu3 }
 0x241   :  { %v3148_v35 = vadd.f32 %v293_v32, %v268_v33  ;;  %v2422_v32 = vor.u32 %v2669_v30, %v2419_v31 }
 0x248   :  { %v295_v34 = vpop.f32.mrf.mxu3 }
 0x249   :  { %v3150_v36 = vadd.f32 %v295_v34, %v268_v33 }
 0x24b   :  { %v298_v37 = vpack.c.bf16 %v3150_v36, %v3148_v35 }
 0x24d   :  { %315 = vmatpush.bf16.msrb.mxu0 %v298_v37  ;;  %389 = vmatpush.bf16.msrb.mxu3 %v298_v37 }
 0x250   :  { %2363 = vmatmul.msk.bf16.vlgmr.msrb.gmra.mxu3 %vm304_vm2, %v2641_v38  ;;  %2338 = vmatmul.msk.bf16.vlgmr.msrb.gmra.mxu0 %vm304_vm2, %v2640_v53  ;;  %v2371_v38 = vld [vmem:[#allocation2] sm:$0xf] }
 0x251   :  { %621 = vmatpush.bf16.msra.mxu0 %v3194_v56 }
 0x255   :  { %622 = vmatpush.bf16.msra.mxu0 %v3201_v60 }
 0x259   :  { %623 = vmatpush.bf16.msra.mxu0 %v2418_v11 }
 0x25d   :  { %624 = vmatpush.bf16.msra.mxu0 %v2410_v22 }
 0x260   :  { %2364 = vmatmul.msk.bf16.gmra.mxu3 %vm304_vm2, %v2642_v39  ;;  %625 = vmatmul.bf16.vlgmr.msra.gmra.mxu0 %v3082_v59  ;;  %v2660_v39 = vld [vmem:[#allocation2 + $0x4] sm:$0xf0] }
 0x261   :  { %635 = vmatpush.bf16.msrb.mxu0 %v2438_v24 }
 0x265   :  { %636 = vmatpush.bf16.msrb.mxu0 %v2430_v29 }
 0x269   :  { %637 = vmatpush.bf16.msrb.mxu0 %v2422_v32 }
 0x270   :  { %2365 = vmatmul.msk.bf16.gmra.mxu3 %vm304_vm2, %v2643_v40  ;;  %v2659_v40 = vld [vmem:[#allocation2 + $0x4] sm:$0xf] }
 0x280   :  { %2366 = vmatmul.msk.bf16.gmra.mxu3 %vm304_vm2, %v2644_v41  ;;  %v2372_v41 = vor.u32 %v2660_v39, %v2371_v38 }
 0x282   :  { %524 = vmatpush.bf16.msrb.mxu1 %v2372_v41 }
 0x286   :  { %793 = vmatpush.bf16.msra.mxu1 %v2438_v24 }
 0x28a   :  { %794 = vmatpush.bf16.msra.mxu1 %v2430_v29 }
 0x28e   :  { %795 = vmatpush.bf16.msra.mxu1 %v2422_v32 }
 0x290   :  { %2367 = vmatmul.msk.bf16.gmra.mxu3 %vm304_vm2, %v2645_v42  ;;  %v2373_v42 = vld [vmem:[#allocation2 + $0x8] sm:$0xf0] }
 0x2a0   :  { %2368 = vmatmul.msk.bf16.gmra.mxu3 %vm304_vm2, %v2646_v43  ;;  %v2667_v43 = vld [vmem:[#allocation2 + $0x44] sm:$0xf] }
 0x2d3   :  { %v3178_v44 = vpop.f32.mrf.mxu3 }
 0x2db   :  { %v3180_v45 = vpop.f32.mrf.mxu3 }
 0x2e3   :  { %v3182_v46 = vpop.f32.mrf.mxu3 }
 0x2eb   :  { %v3184_v47 = vpop.f32.mrf.mxu3 }
 0x2f3   :  { %v3186_v48 = vpop.f32.mrf.mxu3 }
 0x2fb   :  { %v3188_v49 = vpop.f32.mrf.mxu3 }
 0x303   :  { %v406_v50 = vpop.f32.mrf.mxu3 }
 0x30b   :  { %v408_v51 = vpop.f32.mrf.mxu3 }
 0x30c   :  { %v2726_v52 = vpack.i.bf16 %v408_v51, %v406_v50  ;;  %v2411_v50 = vld [vmem:[#allocation2 + $0x48] sm:$0xf0]  ;;  %v2376_v51 = vor.u32 %v2659_v40, %v2373_v42 }
 0x30e   :  { %2727 = vrot.lane.b32.xlu0 %v2726_v52, %s3081_s15  ;;  %v2414_v52 = vor.u32 %v2667_v43, %v2411_v50  ;;  %548 = vmatpush.bf16.msrb.mxu2 %v2376_v51 }
 0x310   :  { %638 = vmatpush.bf16.msrb.mxu0 %v2414_v52  ;;  %796 = vmatpush.bf16.msra.mxu1 %v2414_v52 }
 0x312   :  { %945 = vmatpush.bf16.msra.mxu2 %v3194_v56 }
 0x313   :  { %v3203_v4 = vpop.f32.mrf.mxu3  ;;  %639 = vmatmul.bf16.vlgmr.msrb.gmra.mxu0 %v3082_v59 }
 0x314   :  { %779 = vmatpush.bf16.msra.mxu0 %v3194_v56 }
 0x316   :  { %946 = vmatpush.bf16.msra.mxu2 %v3201_v60 }
 0x318   :  { %780 = vmatpush.bf16.msra.mxu0 %v3201_v60  ;;  %v3223_v60 = vpop.f32.mrf.mxu0 }
 0x31a   :  { %947 = vmatpush.bf16.msra.mxu2 %v2418_v11 }
 0x31b   :  { %v3206_v25 = vpop.f32.mrf.mxu3 }
 0x31c   :  { %v2731_v28 = vpack.i.bf16 %v3206_v25, %v3203_v4  ;;  %781 = vmatpush.bf16.msra.mxu0 %v2418_v11 }
 0x31e   :  { %948 = vmatpush.bf16.msra.mxu2 %v2410_v22 }
 0x320   :  { %782 = vmatpush.bf16.msra.mxu0 %v2410_v22  ;;  %v3225_v61 = vpop.f32.mrf.mxu0 }
 0x323   :  { %v416_v33 = vpop.f32.mrf.mxu3 }
 0x324   :  { %959 = vmatpush.bf16.msrb.mxu0 %v2438_v24 }
 0x328   :  { %960 = vmatpush.bf16.msrb.mxu0 %v2430_v29  ;;  %v626_v62 = vpop.f32.mrf.mxu0  ;;  %v108_v29 = vlaneseq }
 0x32b   :  { %v418_v34 = vpop.f32.mrf.mxu3 }
 0x32c   :  { %v2736_v37 = vpack.i.bf16 %v418_v34, %v416_v33  ;;  %961 = vmatpush.bf16.msrb.mxu0 %v2422_v32  ;;  %v109_v33 = vand.u32 127, %v108_v29 }
 0x32e   :  { %2737 = vrot.lane.b32.xlu2 %v2736_v37, %s3081_s15  ;;  %v3238_v41 = vadd.s32 128, %v109_v33 }
 0x330   :  { %962 = vmatpush.bf16.msrb.mxu0 %v2414_v52  ;;  %v628_v0 = vpop.f32.mrf.mxu0  ;;  %vm114_vm8 = vcmp.lt.s32.totalorder %v3238_v41, 192 }
 0x380   :  { %v2728_v53 = vpop.permute.xlu0 %2727 }
 0x381   :  { %v2730_v54 = vunpack.i.h.bf16 %v2728_v53  ;;  %v2729_v55 = vunpack.i.l.bf16 %v2728_v53 }
 0x383   :  { %v446_v56 = vsel %vm138_vm0, %v3180_v45, %v2730_v54  ;;  %v445_v57 = vsel %vm138_vm0, %v3178_v44, %v2729_v55 }
 0x384   :  { %v459_v58 = vpack.c.bf16 %v446_v56, %v445_v57 }
 0x386   :  { %2401 = vmatmul.msk.bf16.vlgmr.msrb.gmra.mxu1 %vm190_vm1, %v459_v58  ;;  %2404 = vmatmul.msk.bf16.vlgmr.msrb.gmra.mxu2 %vm190_vm1, %v459_v58 }
 0x390   :  { %v640_v6 = vpop.f32.mrf.mxu0 }
 0x398   :  { %v642_v19 = vpop.f32.mrf.mxu0 }
 0x403   :  { %v526_v2 = vpop.f32.mrf.mxu1 }
 0x404   :  { %v527_v45 = vadd.f32 %v526_v2, %v3227_v1 }
 0x406   :  { %v645_v3 = vadd.f32 %v626_v62, %v527_v45 }
 0x408   :  { %v2439_v44 = vmul.f32 -1.442695, %v645_v3 }
 0x409   :  { %v550_v7 = vpop.f32.mrf.mxu2 }
 0x40a   :  { %2809 = vpow2.f32 %v2439_v44  ;;  %v551_v8 = vadd.f32 %v550_v7, %v3230_v5 }
 0x40b   :  { %v528_v9 = vpop.f32.mrf.mxu1 }
 0x40c   :  { %v646_v10 = vadd.f32 %v640_v6, %v551_v8  ;;  %v529_v11 = vadd.f32 %v528_v9, %v3227_v1 }
 0x40e   :  { %v2440_v12 = vmul.f32 -1.442695, %v646_v10  ;;  %v647_v13 = vadd.f32 %v628_v0, %v529_v11 }
 0x410   :  { %v2810_v14 = vpop.eup %2809  ;;  %2811 = vpow2.f32 %v2440_v12  ;;  %v2441_v15 = vmul.f32 -1.442695, %v647_v13 }
 0x411   :  { %v665_v16 = vadd.f32 1.0, %v2810_v14  ;;  %v552_v17 = vpop.f32.mrf.mxu2 }
 0x412   :  { %2813 = vpow2.f32 %v2441_v15  ;;  %v553_v18 = vadd.f32 %v552_v17, %v3230_v5 }
 0x413   :  { %2815 = vrcp.f32 %v665_v16  ;;  %v680_v51 = vand.u32 2147483648, %v665_v16  ;;  %vm674_vm5 = vweird.f32 %v665_v16  ;;  %v678_v56 = vand.u32 2147483647, %v665_v16 }
 0x414   :  { %v648_v20 = vadd.f32 %v642_v19, %v553_v18 }
 0x415   :  { %v681_v3 = vor.u32 1.1754944e-38, %v680_v51  ;;  %vm679_vm11 = vcmp.eq.f32.partialorder %v678_v56, 8.507059e+37 }
 0x416   :  { %v2812_v21 = vpop.eup %2811  ;;  %v2442_v22 = vmul.f32 -1.442695, %v648_v20 }
 0x417   :  { %v666_v23 = vadd.f32 1.0, %v2812_v21 }
 0x418   :  { %v2814_v24 = vpop.eup %2813  ;;  %2817 = vpow2.f32 %v2442_v22 }
 0x419   :  { %v2816_v26 = vpop.eup %2815  ;;  %2819 = vrcp.f32 %v666_v23  ;;  %v3235_v27 = vadd.f32 1.0, %v2814_v24  ;;  %v695_v52 = vand.u32 2147483648, %v666_v23  ;;  %v693_v54 = vand.u32 2147483647, %v666_v23 }
 0x41a   :  { %v670_v30 = vmul.f32 %v2816_v26, %v665_v16  ;;  %vm675_vm3 = vweird.f32 %v2816_v26  ;;  %vm689_vm7 = vweird.f32 %v666_v23 }
 0x41b   :  { %2821 = vrcp.f32 %v3235_v27  ;;  %vm3241_vm6 = vmor %vm674_vm5, %vm675_vm3  ;;  %v696_v0 = vor.u32 1.1754944e-38, %v695_v52  ;;  %vm694_vm10 = vcmp.eq.f32.partialorder %v693_v54, 8.507059e+37  ;;  %v710_v14 = vand.u32 2147483648, %v3235_v27 }
 0x41c   :  { %v671_v31 = vsub.f32 1.0, %v670_v30  ;;  %vm704_vm14 = vweird.f32 %v3235_v27  ;;  %v708_v17 = vand.u32 2147483647, %v3235_v27 }
 0x41d   :  { %v711_v22 = vor.u32 1.1754944e-38, %v710_v14 }
 0x41e   :  { %v2818_v32 = vpop.eup %2817  ;;  %v672_v38 = vmul.f32 %v2816_v26, %v671_v31 }
 0x41f   :  { %v2820_v34 = vpop.eup %2819  ;;  %v668_v37 = vadd.f32 1.0, %v2818_v32 }
 0x420   :  { %v685_v39 = vmul.f32 %v2820_v34, %v666_v23  ;;  %v673_v50 = vadd.f32 %v2816_v26, %v672_v38  ;;  %vm690_vm4 = vweird.f32 %v2820_v34 }
 0x421   :  { %v2822_v40 = vpop.eup %2821  ;;  %2823 = vrcp.f32 %v668_v37  ;;  %vm691_vm9 = vmor %vm689_vm7, %vm690_vm4  ;;  %v725_v13 = vand.u32 2147483648, %v668_v37  ;;  %v723_v16 = vand.u32 2147483647, %v668_v37  ;;  %vm719_vm3 = vweird.f32 %v668_v37 }
 0x422   :  { %2825 = vtanh.f32 %v646_v10  ;;  %v686_v42 = vsub.f32 1.0, %v685_v39  ;;  %v700_v43 = vmul.f32 %v2822_v40, %v3235_v27  ;;  %v677_v63 = vsel %vm3241_vm6, %v2816_v26, %v673_v50 }
 0x423   :  { %2827 = vtanh.f32 %v648_v20  ;;  %v682_v8 = vsel %vm679_vm11, %v681_v3, %v677_v63  ;;  %vm705_vm12 = vweird.f32 %v2822_v40  ;;  %v726_v20 = vor.u32 1.1754944e-38, %v725_v13 }
 0x424   :  { %v687_v53 = vmul.f32 %v2820_v34, %v686_v42  ;;  %v701_v55 = vsub.f32 1.0, %v700_v43  ;;  %vm706_vm15 = vmor %vm704_vm14, %vm705_vm12  ;;  %vm724_vm5 = vcmp.eq.f32.partialorder %v723_v16, 8.507059e+37  ;;  %vm709_vm6 = vcmp.eq.f32.partialorder %v708_v17, 8.507059e+37 }
 0x425   :  { %v733_v27 = vmul.f32 0.0, %v682_v8 }
 0x426   :  { %v688_v58 = vadd.f32 %v2820_v34, %v687_v53  ;;  %v702_v2 = vmul.f32 %v2822_v40, %v701_v55  ;;  %v2738_v53 = vpop.permute.xlu2 %2737 }
 0x427   :  { %v2824_v62 = vpop.eup %2823  ;;  %v2740_v54 = vunpack.i.h.bf16 %v2738_v53  ;;  %v2739_v55 = vunpack.i.l.bf16 %v2738_v53 }
 0x428   :  { %v2826_v45 = vpop.eup %2825  ;;  %v692_v44 = vsel %vm691_vm9, %v2820_v34, %v688_v58  ;;  %v715_v6 = vmul.f32 %v2824_v62, %v668_v37  ;;  %v703_v12 = vadd.f32 %v2822_v40, %v702_v2  ;;  %vm720_vm13 = vweird.f32 %v2824_v62  ;;  %v3284_v58 = vld [vmem:[%s3659_s4 + $0x8] sm:$0xff] }
 0x429   :  { %v697_v7 = vsel %vm694_vm10, %v696_v0, %v692_v44  ;;  %vm721_vm4 = vmor %vm719_vm3, %vm720_vm13  ;;  %v2828_v21 = vpop.eup %2827  ;;  %v449_v56 = vsel %vm138_vm0, %v3186_v48, %v2739_v55  ;;  %vm103_vm9 = vcmp.gt.f32.partialorder %v3284_v58, 0.0 }
 0x42a   :  { %v730_v9 = vsel %vm114_vm8, %v2826_v45, %v697_v7  ;;  %v716_v10 = vsub.f32 1.0, %v715_v6  ;;  %v707_v19 = vsel %vm706_vm15, %v2822_v40, %v703_v12 }
 0x42b   :  { %v735_v11 = vmul.f32 %v730_v9, %v682_v8  ;;  %v712_v26 = vsel %vm709_vm6, %v711_v22, %v707_v19 }
 0x42c   :  { %v717_v15 = vmul.f32 %v2824_v62, %v716_v10  ;;  %v734_v33 = vmul.f32 0.0, %v712_v26 }
 0x42d   :  { %739 = vrot.lane.b32.xlu0 %v735_v11, %s3073_s13 }
 0x42e   :  { %v718_v18 = vadd.f32 %v2824_v62, %v717_v15 }
 0x430   :  { %v722_v23 = vsel %vm721_vm4, %v2824_v62, %v718_v18 }
 0x431   :  { %v727_v24 = vsel %vm724_vm5, %v726_v20, %v722_v23 }
 0x432   :  { %v732_v29 = vsel %vm114_vm8, %v2828_v21, %v727_v24 }
 0x433   :  { %v736_v30 = vmul.f32 %v732_v29, %v712_v26 }
 0x435   :  { %741 = vrot.lane.b32.xlu1 %v736_v30, %s3073_s13 }
 0x43d   :  { %2732 = vrot.lane.b32.xlu1 %v2731_v28, %s3081_s15 }
 0x49f   :  { %v740_v31 = vpop.permute.xlu0 %739 }
 0x4a0   :  { %v745_v32 = vadd.f32 %v740_v31, %v733_v27 }
 0x4a2   :  { %763 = vrot.lane.b32.xlu0 %v745_v32, %s3073_s13  ;;  %2829 = vtanh.f32 %v745_v32 }
 0x4a7   :  { %v742_v34 = vpop.permute.xlu1 %741 }
 0x4a8   :  { %v746_v37 = vadd.f32 %v742_v34, %v734_v33  ;;  %v2830_v38 = vpop.eup %2829 }
 0x4a9   :  { %v749_v50 = vmul.f32 %v2830_v38, %v730_v9 }
 0x4aa   :  { %2831 = vtanh.f32 %v746_v37  ;;  %765 = vrot.lane.b32.xlu1 %v746_v37, %s3073_s13 }
 0x4af   :  { %v2733_v39 = vpop.permute.xlu1 %2732 }
 0x4b0   :  { %v2832_v40 = vpop.eup %2831  ;;  %v2735_v42 = vunpack.i.h.bf16 %v2733_v39  ;;  %v2734_v43 = vunpack.i.l.bf16 %v2733_v39 }
 0x4b1   :  { %v750_v4 = vmul.f32 %v2832_v40, %v732_v29 }
 0x4b2   :  { %v447_v25 = vsel %vm138_vm0, %v3182_v46, %v2734_v43  ;;  %v448_v28 = vsel %vm138_vm0, %v3184_v47, %v2735_v42  ;;  %v450_v46 = vsel %vm138_vm0, %v3188_v49, %v2740_v54  ;;  %v3279_v47 = vld [vmem:[%s3659_s4] sm:$0xff] }
 0x4b3   :  { %v2741_v51 = vpack.i.bf16 %v750_v4, %v749_v50  ;;  %v460_v52 = vpack.c.bf16 %v448_v28, %v447_v25  ;;  %v461_v57 = vpack.c.bf16 %v450_v46, %v449_v56  ;;  %vm102_vm7 = vcmp.gt.f32.partialorder %v3279_v47, 0.0 }
 0x4b5   :  { %2742 = vrot.lane.b32.xlu2 %v2741_v51, %s3073_s13  ;;  %2402 = vmatmul.msk.bf16.gmra.mxu1 %vm190_vm1, %v460_v52 }
 0x4b6   :  { %2405 = vmatmul.msk.bf16.gmra.mxu2 %vm190_vm1, %v460_v52 }
 0x4c5   :  { %2403 = vmatmul.msk.bf16.gmra.mxu1 %vm190_vm1, %v461_v57 }
 0x4c6   :  { %2406 = vmatmul.msk.bf16.gmra.mxu2 %vm190_vm1, %v461_v57 }
 0x50f   :  { %v2743_v48 = vpop.permute.xlu2 %2742 }
 0x510   :  { %v2745_v49 = vunpack.i.h.bf16 %v2743_v48  ;;  %v2744_v62 = vunpack.i.l.bf16 %v2743_v48 }
 0x512   :  { %v3290_v63 = vsel %vm103_vm9, %v2745_v49, 0.0  ;;  %v3294_v0 = vsel %vm102_vm7, %v2744_v62, 0.0 }
 0x513   :  { %v771_v2 = vpack.c.bf16 %v3290_v63, %v3294_v0 }
 0x514   :  { %v764_v45 = vpop.permute.xlu0 %763 }
 0x515   :  { %2443 = vmatmul.msk.bf16.vlgmr.msra.gmra.mxu0 %vm190_vm1, %v771_v2  ;;  %2444 = vmatmul.msk.bf16.vlgmr.msra.gmra.mxu1 %vm190_vm1, %v771_v2  ;;  %v3302_v3 = vsel %vm102_vm7, %v764_v45, 0.0 }
 0x516   :  { %893 = vrot.lane.b32.xlu2 %v3302_v3, %s3073_s13 }
 0x51c   :  { %v766_v44 = vpop.permute.xlu1 %765 }
 0x51d   :  { %v3308_v6 = vsel %vm103_vm9, %v766_v44, 0.0 }
 0x51e   :  { %895 = vrot.lane.b32.xlu0 %v3308_v6, %s3073_s13 }
 0x532   :  { %v531_v7 = vpop.f32.mrf.mxu1 }
 0x533   :  { %v532_v12 = vadd.f32 %v531_v7, %v3227_v1 }
 0x539   :  { %v555_v11 = vpop.f32.mrf.mxu2 }
 0x53a   :  { %v533_v8 = vpop.f32.mrf.mxu1  ;;  %v556_v13 = vadd.f32 %v555_v11, %v3230_v5 }
 0x53b   :  { %v534_v21 = vadd.f32 %v533_v8, %v3227_v1 }
 0x541   :  { %v557_v20 = vpop.f32.mrf.mxu2 }
 0x542   :  { %v3312_v9 = vpop.f32.mrf.mxu1  ;;  %v558_v22 = vadd.f32 %v557_v20, %v3230_v5 }
 0x54a   :  { %v3314_v10 = vpop.f32.mrf.mxu1 }
 0x592   :  { %v784_v14 = vpop.f32.mrf.mxu0  ;;  %v798_v15 = vpop.f32.mrf.mxu1 }
 0x593   :  { %v803_v16 = vadd.f32 %v784_v14, %v532_v12  ;;  %v804_v17 = vadd.f32 %v798_v15, %v556_v13 }
 0x595   :  { %v2445_v18 = vmul.f32 -1.442695, %v803_v16  ;;  %v2446_v19 = vmul.f32 -1.442695, %v804_v17 }
 0x597   :  { %2833 = vpow2.f32 %v2445_v18 }
 0x598   :  { %2835 = vpow2.f32 %v2446_v19 }
 0x59a   :  { %v786_v23 = vpop.f32.mrf.mxu0  ;;  %v800_v24 = vpop.f32.mrf.mxu1 }
 0x59b   :  { %v805_v26 = vadd.f32 %v786_v23, %v534_v21  ;;  %v806_v29 = vadd.f32 %v800_v24, %v558_v22 }
 0x59d   :  { %v2834_v30 = vpop.eup %2833  ;;  %v2447_v27 = vmul.f32 -1.442695, %v805_v26  ;;  %v2448_v33 = vmul.f32 -1.442695, %v806_v29 }
 0x59e   :  { %v2836_v31 = vpop.eup %2835  ;;  %v823_v32 = vadd.f32 1.0, %v2834_v30 }
 0x59f   :  { %v824_v34 = vadd.f32 1.0, %v2836_v31  ;;  %2837 = vpow2.f32 %v2447_v27 }
 0x5a0   :  { %2839 = vrcp.f32 %v823_v32  ;;  %v836_v28 = vand.u32 2147483647, %v823_v32  ;;  %v838_v51 = vand.u32 2147483648, %v823_v32  ;;  %vm832_vm12 = vweird.f32 %v823_v32 }
 0x5a1   :  { %2841 = vrcp.f32 %v824_v34  ;;  %v853_v54 = vand.u32 2147483648, %v824_v34  ;;  %v851_v56 = vand.u32 2147483647, %v824_v34  ;;  %vm847_vm14 = vweird.f32 %v824_v34 }
 0x5a2   :  { %2843 = vpow2.f32 %v2448_v33  ;;  %v839_v48 = vor.u32 1.1754944e-38, %v838_v51  ;;  %vm837_vm15 = vcmp.eq.f32.partialorder %v836_v28, 8.507059e+37 }
 0x5a3   :  { %v854_v2 = vor.u32 1.1754944e-38, %v853_v54  ;;  %vm852_vm4 = vcmp.eq.f32.partialorder %v851_v56, 8.507059e+37  ;;  %v3332_v56 = vld [vmem:[%s3659_s4 + $0x18] sm:$0xff] }
 0x5a5   :  { %v2838_v37 = vpop.eup %2837 }
 0x5a6   :  { %v2840_v38 = vpop.eup %2839  ;;  %v825_v39 = vadd.f32 1.0, %v2838_v37 }
 0x5a7   :  { %v2842_v40 = vpop.eup %2841  ;;  %v828_v42 = vmul.f32 %v2840_v38, %v823_v32  ;;  %vm833_vm10 = vweird.f32 %v2840_v38 }
 0x5a8   :  { %v2844_v43 = vpop.eup %2843  ;;  %2845 = vrcp.f32 %v825_v39  ;;  %v843_v50 = vmul.f32 %v2842_v40, %v824_v34  ;;  %vm848_vm11 = vweird.f32 %v2842_v40  ;;  %vm834_vm13 = vmor %vm832_vm12, %vm833_vm10  ;;  %v868_v18 = vand.u32 2147483648, %v825_v39 }
 0x5a9   :  { %v826_v4 = vadd.f32 1.0, %v2844_v43  ;;  %v829_v25 = vsub.f32 1.0, %v828_v42  ;;  %2847 = vtanh.f32 %v804_v17  ;;  %vm849_vm3 = vmor %vm847_vm14, %vm848_vm11  ;;  %vm862_vm6 = vweird.f32 %v825_v39 }
 0x5aa   :  { %v844_v52 = vsub.f32 1.0, %v843_v50  ;;  %v866_v21 = vand.u32 2147483647, %v825_v39  ;;  %v869_v30 = vor.u32 1.1754944e-38, %v868_v18 }
 0x5ab   :  { %2849 = vrcp.f32 %v826_v4  ;;  %v830_v53 = vmul.f32 %v2840_v38, %v829_v25  ;;  %v883_v22 = vand.u32 2147483648, %v826_v4  ;;  %v881_v24 = vand.u32 2147483647, %v826_v4 }
 0x5ac   :  { %v845_v55 = vmul.f32 %v2842_v40, %v844_v52  ;;  %2851 = vtanh.f32 %v806_v29  ;;  %vm877_vm12 = vweird.f32 %v826_v4 }
 0x5ad   :  { %v831_v46 = vadd.f32 %v2840_v38, %v830_v53  ;;  %v884_v31 = vor.u32 1.1754944e-38, %v883_v22 }
 0x5ae   :  { %v2846_v57 = vpop.eup %2845  ;;  %v846_v49 = vadd.f32 %v2842_v40, %v845_v55 }
 0x5af   :  { %v835_v62 = vsel %vm834_vm13, %v2840_v38, %v831_v46  ;;  %v858_v45 = vmul.f32 %v2846_v57, %v825_v39  ;;  %v2848_v44 = vpop.eup %2847  ;;  %vm863_vm5 = vweird.f32 %v2846_v57  ;;  %vm867_vm13 = vcmp.eq.f32.partialorder %v866_v21, 8.507059e+37  ;;  %v894_v39 = vpop.permute.xlu2 %893 }
 0x5b0   :  { %v840_v7 = vsel %vm837_vm15, %v839_v48, %v835_v62  ;;  %v850_v8 = vsel %vm849_vm3, %v2842_v40, %v846_v49  ;;  %vm864_vm10 = vmor %vm862_vm6, %vm863_vm5  ;;  %vm882_vm15 = vcmp.eq.f32.partialorder %v881_v24, 8.507059e+37  ;;  %v896_v40 = vpop.permute.xlu0 %895  ;;  %vm105_vm3 = vcmp.gt.f32.partialorder %v3332_v56, 0.0  ;;  %v82_v48 = vld [vmem:[%s3657_s2] sm:$0xff]  ;;  %v3345_v49 = vld [vmem:[%s3659_s4 + $0x10] sm:$0xff] }
 0x5b1   :  { %v2850_v11 = vpop.eup %2849  ;;  %v855_v12 = vsel %vm852_vm4, %v854_v2, %v850_v8  ;;  %v859_v13 = vsub.f32 1.0, %v858_v45  ;;  %vm3664_vm4 = vcmp.gt.f32.partialorder %v3345_v49, 0.0 }
 0x5b2   :  { %v888_v14 = vsel %vm114_vm8, %v2848_v44, %v855_v12  ;;  %v873_v15 = vmul.f32 %v2850_v11, %v826_v4  ;;  %vm878_vm11 = vweird.f32 %v2850_v11  ;;  %v2852_v29 = vpop.eup %2851  ;;  %v899_v4 = vmul.f32 %v894_v39, %v840_v7 }
 0x5b3   :  { %v901_v16 = vmul.f32 %v888_v14, %v840_v7  ;;  %v860_v17 = vmul.f32 %v2846_v57, %v859_v13  ;;  %vm879_vm14 = vmor %vm877_vm12, %vm878_vm11 }
 0x5b4   :  { %v874_v19 = vsub.f32 1.0, %v873_v15 }
 0x5b5   :  { %905 = vrot.lane.b32.xlu1 %v901_v16, %s3073_s13  ;;  %v861_v20 = vadd.f32 %v2846_v57, %v860_v17  ;;  %v537_v16 = vadd.f32 %v3312_v9, %v3227_v1 }
 0x5b6   :  { %v875_v23 = vmul.f32 %v2850_v11, %v874_v19 }
 0x5b7   :  { %v865_v26 = vsel %vm864_vm10, %v2846_v57, %v861_v20 }
 0x5b8   :  { %v876_v27 = vadd.f32 %v2850_v11, %v875_v23  ;;  %v870_v32 = vsel %vm867_vm13, %v869_v30, %v865_v26  ;;  %v539_v26 = vadd.f32 %v3314_v10, %v3227_v1 }
 0x5b9   :  { %v900_v42 = vmul.f32 %v896_v40, %v870_v32 }
 0x5ba   :  { %v880_v33 = vsel %vm879_vm14, %v2850_v11, %v876_v27 }
 0x5bb   :  { %v885_v34 = vsel %vm882_vm15, %v884_v31, %v880_v33 }
 0x5bc   :  { %v890_v37 = vsel %vm114_vm8, %v2852_v29, %v885_v34 }
 0x5bd   :  { %v902_v38 = vmul.f32 %v890_v37, %v870_v32 }
 0x5bf   :  { %907 = vrot.lane.b32.xlu2 %v902_v38, %s3073_s13 }
 0x619   :  { %v908_v43 = vpop.permute.xlu2 %907 }
 0x61a   :  { %v912_v50 = vadd.f32 %v908_v43, %v900_v42 }
 0x61c   :  { %931 = vrot.lane.b32.xlu2 %v912_v50, %s3073_s13  ;;  %2853 = vtanh.f32 %v912_v50 }
 0x622   :  { %v2854_v51 = vpop.eup %2853 }
 0x623   :  { %v916_v54 = vmul.f32 %v2854_v51, %v890_v37 }
 0x627   :  { %v906_v25 = vpop.permute.xlu1 %905 }
 0x628   :  { %v911_v28 = vadd.f32 %v906_v25, %v899_v4 }
 0x62a   :  { %2855 = vtanh.f32 %v911_v28  ;;  %929 = vrot.lane.b32.xlu1 %v911_v28, %s3073_s13 }
 0x630   :  { %v2856_v52 = vpop.eup %2855 }
 0x631   :  { %v915_v53 = vmul.f32 %v2856_v52, %v888_v14 }
 0x633   :  { %v2746_v55 = vpack.i.bf16 %v916_v54, %v915_v53 }
 0x635   :  { %2747 = vrot.lane.b32.xlu0 %v2746_v55, %s3073_s13 }
 0x676   :  { %v932_v46 = vpop.permute.xlu2 %931 }
 0x677   :  { %v936_v57 = vsel %vm105_vm3, %v932_v46, %v3308_v6 }
 0x678   :  { %1061 = vrot.lane.b32.xlu1 %v936_v57, %s3073_s13 }
 0x680   :  { %324 = vperm.xlu1 %2751, %v82_v48  }
 0x69c   :  { %v930_v62 = vpop.permute.xlu1 %929 }
 0x69d   :  { %v935_v2 = vsel %vm3664_vm4, %v930_v62, %v3302_v3  ;;  %v560_v3 = vpop.f32.mrf.mxu2 }
 0x69e   :  { %1059 = vrot.lane.b32.xlu0 %v935_v2, %s3073_s13  ;;  %v561_v13 = vadd.f32 %v560_v3, %v3230_v5 }
 0x6a5   :  { %v562_v12 = vpop.f32.mrf.mxu2 }
 0x6a6   :  { %v563_v17 = vadd.f32 %v562_v12, %v3230_v5 }
 0x6a7   :  { %v2748_v6 = vpop.permute.xlu0 %2747 }
 0x6a8   :  { %v2750_v45 = vunpack.i.h.bf16 %v2748_v6  ;;  %v2749_v44 = vunpack.i.l.bf16 %v2748_v6 }
 0x6aa   :  { %v3355_v7 = vsel %vm105_vm3, %v2750_v45, %v3290_v63  ;;  %v3360_v8 = vsel %vm3664_vm4, %v2749_v44, %v3294_v0 }
 0x6ab   :  { %v937_v11 = vpack.c.bf16 %v3355_v7, %v3360_v8 }
 0x6ad   :  { %2449 = vmatmul.msk.bf16.vlgmr.msra.gmra.mxu2 %vm190_vm1, %v937_v11  ;;  %2450 = vmatmul.msk.bf16.vlgmr.msrb.gmra.mxu0 %vm190_vm1, %v937_v11 }
 0x72a   :  { %v964_v14 = vpop.f32.mrf.mxu0 }
 0x72b   :  { %v970_v15 = vadd.f32 %v964_v14, %v561_v13 }
 0x72d   :  { %v2452_v63 = vmul.f32 -1.442695, %v970_v15 }
 0x72f   :  { %2857 = vpow2.f32 %v2452_v63 }
 0x730   :  { %v950_v0 = vpop.f32.mrf.mxu2 }
 0x731   :  { %v969_v18 = vadd.f32 %v950_v0, %v537_v16 }
 0x732   :  { %v966_v19 = vpop.f32.mrf.mxu0 }
 0x733   :  { %v2451_v20 = vmul.f32 -1.442695, %v969_v18  ;;  %v972_v21 = vadd.f32 %v966_v19, %v563_v17 }
 0x735   :  { %v2858_v22 = vpop.eup %2857  ;;  %2859 = vpow2.f32 %v2451_v20  ;;  %v2454_v23 = vmul.f32 -1.442695, %v972_v21 }
 0x736   :  { %v990_v24 = vadd.f32 1.0, %v2858_v22 }
 0x737   :  { %2861 = vpow2.f32 %v2454_v23 }
 0x738   :  { %2863 = vrcp.f32 %v990_v24  ;;  %v952_v30 = vpop.f32.mrf.mxu2  ;;  %v1019_v43 = vand.u32 2147483648, %v990_v24  ;;  %vm1013_vm6 = vweird.f32 %v990_v24  ;;  %v1017_v4 = vand.u32 2147483647, %v990_v24 }
 0x739   :  { %v971_v27 = vadd.f32 %v952_v30, %v539_v26 }
 0x73a   :  { %v1020_v55 = vor.u32 1.1754944e-38, %v1019_v43  ;;  %vm1018_vm12 = vcmp.eq.f32.partialorder %v1017_v4, 8.507059e+37 }
 0x73b   :  { %v2860_v9 = vpop.eup %2859  ;;  %v2453_v31 = vmul.f32 -1.442695, %v971_v27 }
 0x73c   :  { %v989_v29 = vadd.f32 1.0, %v2860_v9 }
 0x73d   :  { %v2862_v32 = vpop.eup %2861  ;;  %2865 = vpow2.f32 %v2453_v31 }
 0x73e   :  { %v2864_v5 = vpop.eup %2863  ;;  %2867 = vrcp.f32 %v989_v29  ;;  %v992_v33 = vadd.f32 1.0, %v2862_v32  ;;  %v1002_v51 = vand.u32 2147483647, %v989_v29  ;;  %v1004_v52 = vand.u32 2147483648, %v989_v29 }
 0x73f   :  { %v1009_v34 = vmul.f32 %v2864_v5, %v990_v24  ;;  %vm1014_vm5 = vweird.f32 %v2864_v5  ;;  %vm998_vm13 = vweird.f32 %v989_v29 }
 0x740   :  { %2869 = vrcp.f32 %v992_v33  ;;  %vm1015_vm10 = vmor %vm1013_vm6, %vm1014_vm5  ;;  %vm1003_vm15 = vcmp.eq.f32.partialorder %v1002_v51, 8.507059e+37  ;;  %v1005_v6 = vor.u32 1.1754944e-38, %v1004_v52  ;;  %v1049_v12 = vand.u32 2147483648, %v992_v33  ;;  %v2680_v52 = vld [vmem:[#allocation5 + $0x88] sm:$0xff] }
 0x741   :  { %v1010_v37 = vsub.f32 1.0, %v1009_v34  ;;  %vm1043_vm5 = vweird.f32 %v992_v33 }
 0x742   :  { %v1050_v20 = vor.u32 1.1754944e-38, %v1049_v12 }
 0x743   :  { %v2866_v38 = vpop.eup %2865  ;;  %v1011_v39 = vmul.f32 %v2864_v5, %v1010_v37 }
 0x744   :  { %v2868_v40 = vpop.eup %2867  ;;  %v991_v42 = vadd.f32 1.0, %v2866_v38 }
 0x745   :  { %v994_v1 = vmul.f32 %v2868_v40, %v989_v29  ;;  %v1012_v10 = vadd.f32 %v2864_v5, %v1011_v39  ;;  %vm999_vm11 = vweird.f32 %v2868_v40  ;;  %v1062_v29 = vpop.permute.xlu1 %1061  ;;  %v1060_v39 = vpop.permute.xlu0 %1059 }
 0x746   :  { %v2870_v50 = vpop.eup %2869  ;;  %2871 = vrcp.f32 %v991_v42  ;;  %vm1000_vm14 = vmor %vm998_vm13, %vm999_vm11  ;;  %v1034_v0 = vand.u32 2147483648, %v991_v42  ;;  %v1032_v19 = vand.u32 2147483647, %v991_v42 }
 0x747   :  { %2873 = vtanh.f32 %v970_v15  ;;  %v995_v25 = vsub.f32 1.0, %v994_v1  ;;  %v1039_v28 = vmul.f32 %v2870_v50, %v992_v33  ;;  %v1016_v53 = vsel %vm1015_vm10, %v2864_v5, %v1012_v10 }
 0x748   :  { %v1021_v48 = vsel %vm1018_vm12, %v1020_v55, %v1016_v53  ;;  %vm1044_vm4 = vweird.f32 %v2870_v50  ;;  %v1047_v15 = vand.u32 2147483647, %v992_v33  ;;  %2875 = vtanh.f32 %v972_v21  ;;  %v83_v21 = vld [vmem:[%s3657_s2 + $0x8] sm:$0xff]  ;;  %v2679_v53 = vld [vmem:[#allocation5 + $0x80] sm:$0xff]  ;;  %v2677_v55 = vld [vmem:[#allocation5 + $0x70] sm:$0xff] }
 0x749   :  { %v996_v54 = vmul.f32 %v2868_v40, %v995_v25  ;;  %v1040_v46 = vsub.f32 1.0, %v1039_v28  ;;  %vm1045_vm6 = vmor %vm1043_vm5, %vm1044_vm4  ;;  %vm1028_vm12 = vweird.f32 %v991_v42  ;;  %v1035_v24 = vor.u32 1.1754944e-38, %v1034_v0 }
 0x74a   :  { %vm1048_vm11 = vcmp.eq.f32.partialorder %v1047_v15, 8.507059e+37 }
 0x74b   :  { %v997_v57 = vadd.f32 %v2868_v40, %v996_v54  ;;  %v1041_v62 = vmul.f32 %v2870_v50, %v1040_v46  ;;  %v2678_v54 = vld [vmem:[#allocation5 + $0x78] sm:$0xff]  ;;  %v2676_v46 = vld [vmem:[#allocation5 + $0x68] sm:$0xff] }
 0x74c   :  { %v2872_v2 = vpop.eup %2871 }
 0x74d   :  { %v2874_v45 = vpop.eup %2873  ;;  %v1001_v44 = vsel %vm1000_vm14, %v2868_v40, %v997_v57  ;;  %v1024_v11 = vmul.f32 %v2872_v2, %v991_v42  ;;  %v1042_v3 = vadd.f32 %v2870_v50, %v1041_v62  ;;  %vm1029_vm10 = vweird.f32 %v2872_v2  ;;  %v3381_v5 = vpop.permute.xlu1 %324  ;;  %v3394_v57 = vld [vmem:[%s3659_s4 + $0x20] sm:$0xff] }
 0x74e   :  { %v1006_v13 = vsel %vm1003_vm15, %v1005_v6, %v1001_v44  ;;  %v1054_v14 = vsel %vm114_vm8, %v2874_v45, %v1021_v48  ;;  %vm1030_vm13 = vmor %vm1028_vm12, %vm1029_vm10  ;;  %v2876_v26 = vpop.eup %2875  ;;  %vm1033_vm14 = vcmp.eq.f32.partialorder %v1032_v19, 8.507059e+37  ;;  %v332_v34 = vmul.f32 %v3381_v5, %v3223_v60  ;;  %v2682_v60 = vld [vmem:[#allocation5 + $0x98] sm:$0xff]  ;;  %v3399_v48 = vld [vmem:[%s3659_s4 + $0x28] sm:$0xff] }
 0x74f   :  { %v1067_v63 = vmul.f32 %v1054_v14, %v1006_v13  ;;  %v1025_v16 = vsub.f32 1.0, %v1024_v11  ;;  %v1046_v17 = vsel %vm1045_vm6, %v2870_v50, %v1042_v3  ;;  %v1065_v40 = vmul.f32 %v1060_v39, %v1006_v13  ;;  %1179 = vmatpush.bf16.msrb.mxu1 %v2682_v60  ;;  %v2675_v3 = vld [vmem:[#allocation5 + $0x60] sm:$0xff]  ;;  %v1130_v19 = vld [vmem:[#allocation7 + $0x5] ss:$0 sm:$0xff] }
 0x750   :  { %v1051_v23 = vsel %vm1048_vm11, %v1050_v20, %v1046_v17  ;;  %vm106_vm4 = vcmp.gt.f32.partialorder %v3394_v57, 0.0  ;;  %vm107_vm15 = vcmp.gt.f32.partialorder %v3399_v48, 0.0 }
 0x751   :  { %1071 = vrot.lane.b32.xlu2 %v1067_v63, %s3073_s13  ;;  %v1026_v18 = vmul.f32 %v2872_v2, %v1025_v16  ;;  %v1056_v9 = vsel %vm114_vm8, %v2876_v26, %v1051_v23 }
 0x753   :  { %v1027_v22 = vadd.f32 %v2872_v2, %v1026_v18 }
 0x755   :  { %v1031_v30 = vsel %vm1030_vm13, %v2872_v2, %v1027_v22 }
 0x756   :  { %v1036_v27 = vsel %vm1033_vm14, %v1035_v24, %v1031_v30 }
 0x757   :  { %v1068_v31 = vmul.f32 %v1056_v9, %v1036_v27  ;;  %v1066_v1 = vmul.f32 %v1062_v29, %v1036_v27  ;;  %v3083_v29 = vmov 32.0  }
 0x759   :  { %329 = vperm.xlu2 %2752, %v83_v21   ;;  %1073 = vrot.lane.b32.xlu0 %v1068_v31, %s3073_s13 }
 0x7ab   :  { %v1072_v32 = vpop.permute.xlu2 %1071 }
 0x7ac   :  { %v1077_v42 = vadd.f32 %v1072_v32, %v1065_v40 }
 0x7ae   :  { %2877 = vtanh.f32 %v1077_v42 }
 0x7b3   :  { %v3383_v33 = vpop.permute.xlu2 %329 }
 0x7b4   :  { %v333_v37 = vmul.f32 %v3383_v33, %v3225_v61  ;;  %v2878_v50 = vpop.eup %2877  ;;  %v2681_v61 = vld [vmem:[#allocation5 + $0x90] sm:$0xff] }
 0x7b5   :  { %v1081_v25 = vmul.f32 %v2878_v50, %v1054_v14  ;;  %1180 = vmatpush.bf16.msrb.mxu1 %v2681_v61 }
 0x7b6   :  { %v2758_v38 = vpack.i.bf16 %v333_v37, %v332_v34 }
 0x7b8   :  { %2759 = vrot.lane.b32.xlu1 %v2758_v38, %s3081_s15 }
 0x7b9   :  { %1181 = vmatpush.bf16.msrb.mxu1 %v2680_v52 }
 0x7bd   :  { %1182 = vmatpush.bf16.msrb.mxu1 %v2679_v53 }
 0x7c1   :  { %1183 = vmatpush.bf16.msrb.mxu1 %v2678_v54 }
 0x7c5   :  { %1184 = vmatpush.bf16.msrb.mxu1 %v2677_v55 }
 0x7c9   :  { %1185 = vmatpush.bf16.msrb.mxu1 %v2676_v46 }
 0x7cb   :  { %v1074_v10 = vpop.permute.xlu0 %1073 }
 0x7cc   :  { %v1078_v43 = vadd.f32 %v1074_v10, %v1066_v1 }
 0x7cd   :  { %1186 = vmatpush.bf16.msrb.mxu1 %v2675_v3 }
 0x7ce   :  { %2879 = vtanh.f32 %v1078_v43 }
 0x7cf   :  { %2881 = vrcp.f32 %v3083_v29  ;;  %v2969_v29 = vld [vmem:[%s3658_s3 + $0x28] sm:$0xff] }
 0x7d4   :  { %v2880_v4 = vpop.eup %2879 }
 0x7d5   :  { %v1082_v28 = vmul.f32 %v2880_v4, %v1056_v9  ;;  %v2882_v32 = vpop.eup %2881 }
 0x7d6   :  { %v1204_v34 = vmul.f32 32.0, %v2882_v32  ;;  %vm1208_vm5 = vweird.f32 %v2882_v32 }
 0x7d7   :  { %v2753_v51 = vpack.i.bf16 %v1082_v28, %v1081_v25 }
 0x7d8   :  { %v1205_v37 = vsub.f32 1.0, %v1204_v34 }
 0x7d9   :  { %2754 = vrot.lane.b32.xlu0 %v2753_v51, %s3073_s13 }
 0x7da   :  { %v1206_v38 = vmul.f32 %v2882_v32, %v1205_v37 }
 0x7dc   :  { %v1207_v39 = vadd.f32 %v2882_v32, %v1206_v38 }
 0x82a   :  { %v2760_v12 = vpop.permute.xlu1 %2759 }
 0x82b   :  { %v2762_v13 = vunpack.i.h.bf16 %v2760_v12  ;;  %v2761_v14 = vunpack.i.l.bf16 %v2760_v12 }
 0x82d   :  { %v1110_v0 = vsel %vm138_vm0, %v3150_v36, %v2762_v13 }
 0x84b   :  { %v2755_v62 = vpop.permute.xlu0 %2754 }
 0x84c   :  { %v2757_v2 = vunpack.i.h.bf16 %v2755_v62  ;;  %v2756_v6 = vunpack.i.l.bf16 %v2755_v62 }
 0x84e   :  { %v1091_v45 = vsel %vm106_vm4, %v2756_v6, %v3360_v8  ;;  %v1092_v44 = vsel %vm107_vm15, %v2757_v2, %v3355_v7  ;;  %v1109_v8 = vsel %vm138_vm0, %v3148_v35, %v2761_v14 }
 0x84f   :  { %v2763_v11 = vpack.i.bf16 %v1092_v44, %v1091_v45 }
 0x851   :  { %2764 = vrot.lane.b32.xlu2 %v2763_v11, %s3073_s13 }
 0x8ab   :  { %v2765_v15 = vpop.permute.xlu2 %2764 }
 0x8ac   :  { %v2767_v63 = vunpack.i.h.bf16 %v2765_v15  ;;  %v2766_v16 = vunpack.i.l.bf16 %v2765_v15  ;;  %v1248_v15 = vld [vmem:[#allocation7 + $0x7] ss:$0 sm:$0xff] }
 0x8ae   :  { %v1112_v17 = vsel %vm190_vm1, %v1110_v0, %v2767_v63  ;;  %v1111_v7 = vsel %vm190_vm1, %v1109_v8, %v2766_v16 }
 0x8af   :  { %v1129_v18 = vpack.c.bf16 %v1112_v17, %v1111_v7  ;;  %v1251_v17 = vld [vmem:[#allocation7 + $0x10] ss:$0 sm:$0xff] }
 0x8b1   :  { %1187 = vmatmul.bf16.vlgmr.msrb.gmra.mxu1 %v1129_v18 }
 0x92e   :  { %v1188_v20 = vpop.f32.mrf.mxu1 }
 0x92f   :  { %v1189_v22 = vadd.f32 %v1188_v20, %v1130_v19 }
 0x931   :  { %v1193_v23 = vmul.f32 0.33333334, %v1189_v22 }
 0x933   :  { %v1195_v24 = vadd.f32 %v1193_v23, %v3148_v35  ;;  %v3420_v35 = vsel %vm1208_vm5, %v2882_v32, %v1207_v39 }
 0x935   :  { %v1197_v26 = vsel %vm138_vm0, %v1195_v24, 0.0 }
 0x936   :  { %v1190_v30 = vpop.f32.mrf.mxu1  ;;  %1198 = vadd.xlane.f32.xlu0 %v1197_v26  ;;  %v2963_v26 = vld [vmem:[%s3656_s1] sm:$0xff] }
 0x937   :  { %v1191_v21 = vadd.f32 %v1190_v30, %v1130_v19  ;;  %v2964_v30 = vld [vmem:[%s3658_s3] sm:$0xff] }
 0x939   :  { %v1194_v27 = vmul.f32 0.33333334, %v1191_v21  ;;  %v2965_v21 = vld [vmem:[%s3658_s3 + $0x8] sm:$0xff] }
 0x93b   :  { %v1196_v9 = vadd.f32 %v1194_v27, %v3150_v36  ;;  %v2966_v27 = vld [vmem:[%s3658_s3 + $0x10] sm:$0xff] }
 0x93d   :  { %v1200_v31 = vsel %vm138_vm0, %v1196_v9, 0.0 }
 0x93e   :  { %1201 = vadd.xlane.f32.xlu1 %v1200_v31  ;;  %v2968_v31 = vld [vmem:[%s3658_s3 + $0x20] sm:$0xff] }
 0x9a9   :  { %v1199_v40 = vpop.xlane.xlu0 %1198 }
 0x9aa   :  { %v1210_v42 = vmul.f32 %v3420_v35, %v1199_v40 }
 0x9ac   :  { %v1212_v1 = vsub.f32 %v1195_v24, %v1210_v42  ;;  %v2689_v42 = vld [vmem:[#allocation2 + $0xb4] sm:$0xf] }
 0x9ae   :  { %v1214_v10 = vmul.f32 %v1212_v1, %v1212_v1 }
 0x9b0   :  { %v1216_v36 = vsel %vm138_vm0, %v1214_v10, 0.0  ;;  %v2687_v10 = vld [vmem:[#allocation2 + $0xa4] sm:$0xf] }
 0x9b1   :  { %v1202_v43 = vpop.xlane.xlu1 %1201  ;;  %1217 = vadd.xlane.f32.xlu2 %v1216_v36 }
 0x9b2   :  { %v1211_v50 = vmul.f32 %v3420_v35, %v1202_v43  ;;  %v2514_v43 = vld [vmem:[#allocation2 + $0xa8] sm:$0xf0] }
 0x9b4   :  { %v1213_v4 = vsub.f32 %v1196_v9, %v1211_v50  ;;  %v2967_v9 = vld [vmem:[%s3658_s3 + $0x18] sm:$0xff]  ;;  %v2558_v50 = vld [vmem:[#allocation2 + $0xf0] sm:$0xf]  ;;  %s3084_s3 = smov [#allocation8]  }
 0x9b6   :  { %v1215_v25 = vmul.f32 %v1213_v4, %v1213_v4 }
 0x9b8   :  { %v1219_v28 = vsel %vm138_vm0, %v1215_v25, 0.0  ;;  %v2550_v25 = vld [vmem:[#allocation2 + $0xe0] sm:$0xf] }
 0x9b9   :  { %1220 = vadd.xlane.f32.xlu2 %v1219_v28  ;;  %v2517_v28 = vor.u32 %v2687_v10, %v2514_v43  ;;  %v2684_v43 = vld [vmem:[#allocation2 + $0x84] sm:$0xf0] }
 0xa24   :  { %v1218_v51 = vpop.xlane.xlu2 %1217 }
 0xa25   :  { %v1222_v60 = vmul.f32 %v1218_v51, %v3420_v35 }
 0xa27   :  { %v1224_v61 = vadd.f32 1e-05, %v1222_v60  ;;  %v2696_v60 = vld [vmem:[#allocation2 + $0xe4] sm:$0xf0] }
 0xa29   :  { %2883 = vrsqrt.f32 %v1224_v61  ;;  %vm1232_vm10 = vweird.f32 %v1224_v61 }
 0xa2c   :  { %v1221_v52 = vpop.xlane.xlu2 %1220 }
 0xa2d   :  { %v1223_v53 = vmul.f32 %v1221_v52, %v3420_v35  ;;  %v2690_v52 = vld [vmem:[#allocation2 + $0xb4] sm:$0xf0] }
 0xa2f   :  { %v2884_v54 = vpop.eup %2883  ;;  %v1225_v55 = vadd.f32 1e-05, %v1223_v53  ;;  %v2685_v53 = vld [vmem:[#allocation2 + $0x94] sm:$0xf] }
 0xa30   :  { %v1227_v46 = vmul.f32 %v2884_v54, %v1224_v61  ;;  %vm1233_vm6 = vweird.f32 %v2884_v54  ;;  %v2520_v61 = vld [vmem:[#allocation2 + $0xb0] sm:$0xf] }
 0xa31   :  { %2885 = vrsqrt.f32 %v1225_v55  ;;  %vm1234_vm11 = vmor %vm1232_vm10, %vm1233_vm6  ;;  %vm1242_vm13 = vweird.f32 %v1225_v55 }
 0xa32   :  { %v1228_v62 = vmul.f32 %v2884_v54, %v1227_v46  ;;  %v2512_v46 = vld [vmem:[#allocation2 + $0xa0] sm:$0xf] }
 0xa34   :  { %v1229_v2 = vmul.f32 0.5, %v1228_v62 }
 0xa36   :  { %v1230_v6 = vsub.f32 1.5, %v1229_v2  ;;  %v2551_v2 = vor.u32 %v2696_v60, %v2550_v25  ;;  %v2536_v25 = vld [vmem:[#allocation2 + $0xc8] sm:$0xf0] }
 0xa37   :  { %v2886_v45 = vpop.eup %2885 }
 0xa38   :  { %v1231_v44 = vmul.f32 %v2884_v54, %v1230_v6  ;;  %v1237_v11 = vmul.f32 %v2886_v45, %v1225_v55  ;;  %vm1243_vm12 = vweird.f32 %v2886_v45  ;;  %v2521_v55 = vor.u32 %v2690_v52, %v2520_v61  ;;  %v2688_v6 = vld [vmem:[#allocation2 + $0xa4] sm:$0xf0] }
 0xa39   :  { %vm1244_vm14 = vmor %vm1242_vm13, %vm1243_vm12 }
 0xa3a   :  { %v1235_v3 = vsel %vm1234_vm11, %v2884_v54, %v1231_v44  ;;  %v1238_v12 = vmul.f32 %v2886_v45, %v1237_v11  ;;  %v2506_v54 = vld [vmem:[#allocation2 + $0x98] sm:$0xf0]  ;;  %v2694_v44 = vld [vmem:[#allocation2 + $0xd4] sm:$0xf0]  ;;  %v2513_v11 = vor.u32 %v2688_v6, %v2512_v46 }
 0xa3b   :  { %v1246_v14 = vmul.f32 %v1235_v3, %v1212_v1  ;;  %v2522_v1 = vld [vmem:[#allocation2 + $0xb8] sm:$0xf0]  ;;  %v2509_v3 = vor.u32 %v2685_v53, %v2506_v54 }
 0xa3c   :  { %v1239_v13 = vmul.f32 0.5, %v1238_v12  ;;  %v2525_v36 = vor.u32 %v2689_v42, %v2522_v1  ;;  %v2504_v12 = vld [vmem:[#allocation2 + $0x90] sm:$0xf]  ;;  %v2693_v42 = vld [vmem:[#allocation2 + $0xd4] sm:$0xf] }
 0xa3d   :  { %v1249_v0 = vmul.f32 %v1248_v15, %v1246_v14  ;;  %v2683_v14 = vld [vmem:[#allocation2 + $0x84] sm:$0xf]  ;;  %v2544_v1 = vld [vmem:[#allocation2 + $0xd8] sm:$0xf0] }
 0xa3e   :  { %v1240_v63 = vsub.f32 1.5, %v1239_v13  ;;  %1438 = vmatpush.bf16.msra.mxu3 %v2525_v36  ;;  %v2686_v13 = vld [vmem:[#allocation2 + $0x94] sm:$0xf0]  ;;  %v2547_v10 = vor.u32 %v2693_v42, %v2544_v1  ;;  %v2496_v36 = vld [vmem:[#allocation2 + $0x80] sm:$0xf] }
 0xa3f   :  { %v1252_v19 = vadd.f32 %v1251_v17, %v1249_v0  ;;  %v2692_v0 = vld [vmem:[#allocation2 + $0xc4] sm:$0xf0] }
 0xa40   :  { %v1241_v16 = vmul.f32 %v2886_v45, %v1240_v63 }
 0xa41   :  { %v3428_v22 = vmax.f32 %v1252_v19, 0.0 }
 0xa42   :  { %v1245_v8 = vsel %vm1244_vm14, %v2886_v45, %v1241_v16  ;;  %v2542_v45 = vld [vmem:[#allocation2 + $0xd0] sm:$0xf]  ;;  %1439 = vmatpush.bf16.msra.mxu3 %v2517_v28  ;;  %v2534_v16 = vld [vmem:[#allocation2 + $0xc0] sm:$0xf] }
 0xa43   :  { %v1247_v7 = vmul.f32 %v1245_v8, %v1213_v4  ;;  %v2698_v4 = vld [vmem:[#allocation2 + $0xf4] sm:$0xf0]  ;;  %v2543_v63 = vor.u32 %v2694_v44, %v2542_v45  ;;  %v2505_v8 = vor.u32 %v2686_v13, %v2504_v12 }
 0xa44   :  { %v3474_v51 = vor.u32 %v2698_v4, %v2558_v50  ;;  %v2691_v50 = vld [vmem:[#allocation2 + $0xc4] sm:$0xf]  ;;  %v2497_v4 = vor.u32 %v2684_v43, %v2496_v36 }
 0xa45   :  { %v1250_v18 = vmul.f32 %v1248_v15, %v1247_v7  ;;  %v2498_v15 = vld [vmem:[#allocation2 + $0x88] sm:$0xf0]  ;;  %v2697_v7 = vld [vmem:[#allocation2 + $0xf4] sm:$0xf]  ;;  %v2539_v28 = vor.u32 %v2691_v50, %v2536_v25 }
 0xa46   :  { %1511 = vmatpush.bf16.msra.mxu1 %v3474_v51  ;;  %1440 = vmatpush.bf16.msra.mxu3 %v2509_v3 }
 0xa47   :  { %v1253_v20 = vadd.f32 %v1251_v17, %v1250_v18  ;;  %v2501_v17 = vor.u32 %v2683_v14, %v2498_v15  ;;  %v2560_v18 = vld [vmem:[#allocation2 + $0xf8] sm:$0xf0] }
 0xa49   :  { %v3430_v23 = vmax.f32 %v1253_v20, 0.0  ;;  %v2535_v20 = vor.u32 %v2692_v0, %v2534_v16 }
 0xa4a   :  { %1512 = vmatpush.bf16.msra.mxu1 %v2551_v2  ;;  %1441 = vmatpush.bf16.msra.mxu3 %v2501_v17 }
 0xa4b   :  { %v1256_v24 = vpack.c.bf16 %v3430_v23, %v3428_v22 }
 0xa4d   :  { %1264 = vmatpush.bf16.msrb.mxu2 %v1256_v24  ;;  %1280 = vmatpush.bf16.msra.mxu0 %v1256_v24 }
 0xa4e   :  { %1513 = vmatpush.bf16.msra.mxu1 %v2543_v63  ;;  %1835 = vmatpush.bf16.msrb.mxu3 %v3474_v51 }
 0xa50   :  { %2487 = vmatmul.msk.bf16.vlgmr.msrb.gmra.mxu2 %vm304_vm2, %v2963_v26  ;;  %2488 = vmatmul.msk.bf16.vlgmr.msra.gmra.mxu0 %vm304_vm2, %v2964_v30  ;;  %v2563_v26 = vor.u32 %v2697_v7, %v2560_v18 }
 0xa51   :  { %1414 = vmatpush.bf16.msra.mxu2 %v2521_v55 }
 0xa52   :  { %1514 = vmatpush.bf16.msra.mxu1 %v2535_v20  ;;  %1836 = vmatpush.bf16.msrb.mxu3 %v2551_v2 }
 0xa55   :  { %1415 = vmatpush.bf16.msra.mxu2 %v2513_v11  ;;  %1515 = vmatmul.bf16.vlgmr.msra.gmra.mxu1 %v3082_v59  ;;  %v1355_v11 = vld [vmem:[#allocation7 + $0x1] ss:$8 sm:$0x3] }
 0xa56   :  { %1525 = vmatpush.bf16.msrb.mxu1 %v2563_v26  ;;  %1837 = vmatpush.bf16.msrb.mxu3 %v2543_v63  ;;  %v3499_v3 = vperm.slane %v1355_v11, 0  ;;  %v3501_v12 = vperm.slane %v1355_v11, 1 }
 0xa59   :  { %1416 = vmatpush.bf16.msra.mxu2 %v2505_v8 }
 0xa5a   :  { %1838 = vmatpush.bf16.msrb.mxu3 %v2535_v20 }
 0xa5d   :  { %1417 = vmatpush.bf16.msra.mxu2 %v2497_v4 }
 0xa60   :  { %2489 = vmatmul.msk.bf16.gmra.mxu0 %vm304_vm2, %v2965_v21 }
 0xa61   :  { %1683 = vmatpush.bf16.msrb.mxu2 %v2563_v26 }
 0xa70   :  { %2490 = vmatmul.msk.bf16.gmra.mxu0 %vm304_vm2, %v2966_v27 }
 0xa80   :  { %2491 = vmatmul.msk.bf16.gmra.mxu0 %vm304_vm2, %v2967_v9  ;;  %v2695_v9 = vld [vmem:[#allocation2 + $0xe4] sm:$0xf] }
 0xa90   :  { %2492 = vmatmul.msk.bf16.gmra.mxu0 %vm304_vm2, %v2968_v31  ;;  %v2552_v31 = vld [vmem:[#allocation2 + $0xe8] sm:$0xf0] }
 0xaa0   :  { %2493 = vmatmul.msk.bf16.gmra.mxu0 %vm304_vm2, %v2969_v29  ;;  %v2555_v29 = vor.u32 %v2695_v9, %v2552_v31 }
 0xaa2   :  { %1526 = vmatpush.bf16.msrb.mxu1 %v2555_v29  ;;  %1684 = vmatpush.bf16.msrb.mxu2 %v2555_v29 }
 0xaa6   :  { %1527 = vmatpush.bf16.msrb.mxu1 %v2547_v10  ;;  %1685 = vmatpush.bf16.msrb.mxu2 %v2547_v10 }
 0xaaa   :  { %1528 = vmatpush.bf16.msrb.mxu1 %v2539_v28  ;;  %1686 = vmatpush.bf16.msrb.mxu2 %v2539_v28 }
 0xaad   :  { %1529 = vmatmul.bf16.vlgmr.msrb.gmra.mxu1 %v3082_v59 }
 0xaae   :  { %1669 = vmatpush.bf16.msra.mxu1 %v3474_v51 }
 0xab2   :  { %1670 = vmatpush.bf16.msra.mxu1 %v2551_v2 }
 0xab6   :  { %1671 = vmatpush.bf16.msra.mxu1 %v2543_v63 }
 0xaba   :  { %1672 = vmatpush.bf16.msra.mxu1 %v2535_v20 }
 0xabe   :  { %1849 = vmatpush.bf16.msrb.mxu1 %v2563_v26 }
 0xac2   :  { %1850 = vmatpush.bf16.msrb.mxu1 %v2555_v29 }
 0xac6   :  { %1851 = vmatpush.bf16.msrb.mxu1 %v2547_v10 }
 0xaca   :  { %1852 = vmatpush.bf16.msrb.mxu1 %v2539_v28 }
 0xacd   :  { %v3462_v32 = vpop.f32.mrf.mxu0 }
 0xad5   :  { %v3464_v34 = vpop.f32.mrf.mxu0 }
 0xadd   :  { %v3466_v37 = vpop.f32.mrf.mxu0 }
 0xae5   :  { %v3468_v38 = vpop.f32.mrf.mxu0 }
 0xaed   :  { %v3470_v39 = vpop.f32.mrf.mxu0 }
 0xaf5   :  { %v3472_v40 = vpop.f32.mrf.mxu0 }
 0xafd   :  { %v1297_v62 = vpop.f32.mrf.mxu0 }
 0xb05   :  { %v1299_v19 = vpop.f32.mrf.mxu0 }
 0xb06   :  { %v2768_v24 = vpack.i.bf16 %v1299_v19, %v1297_v62 }
 0xb08   :  { %2769 = vrot.lane.b32.xlu0 %v2768_v24, %s3081_s15 }
 0xb0d   :  { %v1302_v30 = vpop.f32.mrf.mxu0 }
 0xb15   :  { %v1304_v21 = vpop.f32.mrf.mxu0 }
 0xb16   :  { %v2773_v27 = vpack.i.bf16 %v1304_v21, %v1302_v30 }
 0xb18   :  { %2774 = vrot.lane.b32.xlu0 %v2773_v27, %s3081_s15 }
 0xb7a   :  { %v2770_v60 = vpop.permute.xlu0 %2769 }
 0xb7b   :  { %v2772_v61 = vunpack.i.h.bf16 %v2770_v60  ;;  %v2771_v52 = vunpack.i.l.bf16 %v2770_v60 }
 0xb7d   :  { %v1337_v53 = vsel %vm138_vm0, %v3464_v34, %v2772_v61  ;;  %v1336_v51 = vsel %vm138_vm0, %v3462_v32, %v2771_v52  ;;  %v1516_v32 = vpop.f32.mrf.mxu1  ;;  %v3495_v34 = vpop.f32.mrf.mxu2 }
 0xb7e   :  { %v1351_v59 = vpack.c.bf16 %v1337_v53, %v1336_v51 }
 0xb80   :  { %2526 = vmatmul.msk.bf16.vlgmr.msra.gmra.mxu2 %vm190_vm1, %v1351_v59  ;;  %2529 = vmatmul.msk.bf16.vlgmr.msra.gmra.mxu3 %vm190_vm1, %v1351_v59  ;;  %v1307_v59 = vpop.f32.mrf.mxu0 }
 0xb85   :  { %v1518_v45 = vpop.f32.mrf.mxu1  ;;  %v3497_v44 = vpop.f32.mrf.mxu2 }
 0xb8a   :  { %v2775_v54 = vpop.permute.xlu0 %2774 }
 0xb8b   :  { %v2777_v55 = vunpack.i.h.bf16 %v2775_v54  ;;  %v2776_v46 = vunpack.i.l.bf16 %v2775_v54 }
 0xb8d   :  { %v1338_v62 = vsel %vm138_vm0, %v3466_v37, %v2776_v46  ;;  %v1339_v2 = vsel %vm138_vm0, %v3468_v38, %v2777_v55  ;;  %v1530_v37 = vpop.f32.mrf.mxu1 }
 0xb8e   :  { %v1352_v6 = vpack.c.bf16 %v1339_v2, %v1338_v62 }
 0xb90   :  { %2527 = vmatmul.msk.bf16.gmra.mxu2 %vm190_vm1, %v1352_v6  ;;  %2530 = vmatmul.msk.bf16.gmra.mxu3 %vm190_vm1, %v1352_v6 }
 0xb95   :  { %v1532_v20 = vpop.f32.mrf.mxu1 }
 0xc03   :  { %v1419_v13 = vpop.f32.mrf.mxu2  ;;  %v1443_v14 = vpop.f32.mrf.mxu3 }
 0xc04   :  { %v1420_v38 = vadd.f32 %v1419_v13, %v3499_v3  ;;  %v1444_v15 = vadd.f32 %v1443_v14, %v3501_v12 }
 0xc06   :  { %v1535_v63 = vadd.f32 %v1516_v32, %v1420_v38  ;;  %v1536_v16 = vadd.f32 %v1530_v37, %v1444_v15 }
 0xc08   :  { %v2564_v0 = vmul.f32 -1.442695, %v1535_v63  ;;  %v2565_v8 = vmul.f32 -1.442695, %v1536_v16 }
 0xc0a   :  { %2887 = vpow2.f32 %v2564_v0 }
 0xc0b   :  { %2889 = vpow2.f32 %v2565_v8  ;;  %v1421_v17 = vpop.f32.mrf.mxu2  ;;  %v1445_v7 = vpop.f32.mrf.mxu3 }
 0xc0c   :  { %v1422_v18 = vadd.f32 %v1421_v17, %v3499_v3  ;;  %v1446_v19 = vadd.f32 %v1445_v7, %v3501_v12 }
 0xc0e   :  { %v1537_v24 = vadd.f32 %v1518_v45, %v1422_v18  ;;  %v1538_v26 = vadd.f32 %v1532_v20, %v1446_v19 }
 0xc10   :  { %v2888_v30 = vpop.eup %2887  ;;  %v2566_v21 = vmul.f32 -1.442695, %v1537_v24  ;;  %v2567_v31 = vmul.f32 -1.442695, %v1538_v26 }
 0xc11   :  { %v2890_v27 = vpop.eup %2889  ;;  %v1555_v9 = vadd.f32 1.0, %v2888_v30  ;;  %v1309_v30 = vpop.f32.mrf.mxu0 }
 0xc12   :  { %v1556_v29 = vadd.f32 1.0, %v2890_v27  ;;  %2891 = vpow2.f32 %v2566_v21 }
 0xc13   :  { %2893 = vrcp.f32 %v1555_v9  ;;  %v1568_v60 = vand.u32 2147483647, %v1555_v9  ;;  %v1570_v61 = vand.u32 2147483648, %v1555_v9  ;;  %vm1564_vm6 = vweird.f32 %v1555_v9 }
 0xc14   :  { %2895 = vrcp.f32 %v1556_v29  ;;  %v1585_v51 = vand.u32 2147483648, %v1556_v29  ;;  %v1583_v55 = vand.u32 2147483647, %v1556_v29  ;;  %vm1579_vm11 = vweird.f32 %v1556_v29 }
 0xc15   :  { %2897 = vpow2.f32 %v2567_v31  ;;  %v1571_v2 = vor.u32 1.1754944e-38, %v1570_v61  ;;  %vm1569_vm12 = vcmp.eq.f32.partialorder %v1568_v60, 8.507059e+37 }
 0xc16   :  { %v1586_v45 = vor.u32 1.1754944e-38, %v1585_v51  ;;  %vm1584_vm14 = vcmp.eq.f32.partialorder %v1583_v55, 8.507059e+37 }
 0xc18   :  { %v2892_v42 = vpop.eup %2891 }
 0xc19   :  { %v2894_v1 = vpop.eup %2893  ;;  %v1557_v10 = vadd.f32 1.0, %v2892_v42 }
 0xc1a   :  { %v2896_v36 = vpop.eup %2895  ;;  %v1560_v43 = vmul.f32 %v2894_v1, %v1555_v9  ;;  %vm1565_vm2 = vweird.f32 %v2894_v1 }
 0xc1b   :  { %v2898_v50 = vpop.eup %2897  ;;  %2899 = vrcp.f32 %v1557_v10  ;;  %v1575_v4 = vmul.f32 %v2896_v36, %v1556_v29  ;;  %vm1580_vm5 = vweird.f32 %v2896_v36  ;;  %vm1566_vm10 = vmor %vm1564_vm6, %vm1565_vm2  ;;  %v1600_v7 = vand.u32 2147483648, %v1557_v10 }
 0xc1c   :  { %v3507_v25 = vadd.f32 1.0, %v2898_v50  ;;  %v1561_v28 = vsub.f32 1.0, %v1560_v43  ;;  %2901 = vtanh.f32 %v1536_v16  ;;  %vm1581_vm13 = vmor %vm1579_vm11, %vm1580_vm5  ;;  %vm1594_vm5 = vweird.f32 %v1557_v10 }
 0xc1d   :  { %v1576_v52 = vsub.f32 1.0, %v1575_v4  ;;  %v1598_v20 = vand.u32 2147483647, %v1557_v10  ;;  %v1601_v31 = vor.u32 1.1754944e-38, %v1600_v7 }
 0xc1e   :  { %2903 = vrcp.f32 %v3507_v25  ;;  %v1562_v53 = vmul.f32 %v2894_v1, %v1561_v28  ;;  %v1615_v24 = vand.u32 2147483648, %v3507_v25  ;;  %v1613_v27 = vand.u32 2147483647, %v3507_v25 }
 0xc1f   :  { %v1577_v54 = vmul.f32 %v2896_v36, %v1576_v52  ;;  %2905 = vtanh.f32 %v1538_v26  ;;  %vm1609_vm11 = vweird.f32 %v3507_v25  ;;  %v2778_v26 = vpack.i.bf16 %v1309_v30, %v1307_v59 }
 0xc20   :  { %v1563_v46 = vadd.f32 %v2894_v1, %v1562_v53  ;;  %v1616_v42 = vor.u32 1.1754944e-38, %v1615_v24 }
 0xc21   :  { %v2900_v62 = vpop.eup %2899  ;;  %v1578_v6 = vadd.f32 %v2896_v36, %v1577_v54 }
 0xc22   :  { %v1567_v32 = vsel %vm1566_vm10, %v2894_v1, %v1563_v46  ;;  %v1590_v11 = vmul.f32 %v2900_v62, %v1557_v10  ;;  %v2902_v37 = vpop.eup %2901  ;;  %vm1595_vm2 = vweird.f32 %v2900_v62 }
 0xc23   :  { %v1572_v13 = vsel %vm1569_vm12, %v1571_v2, %v1567_v32  ;;  %v1582_v14 = vsel %vm1581_vm13, %v2896_v36, %v1578_v6  ;;  %vm1596_vm6 = vmor %vm1594_vm5, %vm1595_vm2  ;;  %vm1599_vm12 = vcmp.eq.f32.partialorder %v1598_v20, 8.507059e+37 }
 0xc24   :  { %v2904_v38 = vpop.eup %2903  ;;  %v1587_v15 = vsel %vm1584_vm14, %v1586_v45, %v1582_v14  ;;  %v1591_v63 = vsub.f32 1.0, %v1590_v11  ;;  %vm1614_vm14 = vcmp.eq.f32.partialorder %v1613_v27, 8.507059e+37  ;;  %v1623_v61 = vmul.f32 0.0, %v1572_v13 }
 0xc25   :  { %v1620_v16 = vsel %vm114_vm8, %v2902_v37, %v1587_v15  ;;  %v1605_v0 = vmul.f32 %v2904_v38, %v3507_v25  ;;  %vm1610_vm10 = vweird.f32 %v2904_v38  ;;  %v2906_v1 = vpop.eup %2905 }
 0xc26   :  { %v1625_v8 = vmul.f32 %v1620_v16, %v1572_v13  ;;  %v1592_v17 = vmul.f32 %v2900_v62, %v1591_v63  ;;  %vm1611_vm13 = vmor %vm1609_vm11, %vm1610_vm10 }
 0xc27   :  { %v1606_v18 = vsub.f32 1.0, %v1605_v0 }
 0xc28   :  { %1629 = vrot.lane.b32.xlu1 %v1625_v8, %s3073_s13  ;;  %v1593_v19 = vadd.f32 %v2900_v62, %v1592_v17  ;;  %v1424_v8 = vpop.f32.mrf.mxu2 }
 0xc29   :  { %v1607_v21 = vmul.f32 %v2904_v38, %v1606_v18  ;;  %v1425_v58 = vadd.f32 %v1424_v8, %v3499_v3 }
 0xc2a   :  { %v1597_v9 = vsel %vm1596_vm6, %v2900_v62, %v1593_v19  ;;  %v1448_v19 = vpop.f32.mrf.mxu3 }
 0xc2b   :  { %v1608_v29 = vadd.f32 %v2904_v38, %v1607_v21  ;;  %v1602_v36 = vsel %vm1599_vm12, %v1601_v31, %v1597_v9  ;;  %v1449_v30 = vadd.f32 %v1448_v19, %v3501_v12 }
 0xc2c   :  { %v1624_v28 = vmul.f32 0.0, %v1602_v36 }
 0xc2d   :  { %v1612_v10 = vsel %vm1611_vm13, %v2904_v38, %v1608_v29 }
 0xc2e   :  { %v1617_v43 = vsel %vm1614_vm14, %v1616_v42, %v1612_v10 }
 0xc2f   :  { %v1622_v50 = vsel %vm114_vm8, %v2906_v1, %v1617_v43 }
 0xc30   :  { %v1626_v4 = vmul.f32 %v1622_v50, %v1602_v36  ;;  %2779 = vrot.lane.b32.xlu1 %v2778_v26, %s3081_s15  ;;  %v1426_v17 = vpop.f32.mrf.mxu2 }
 0xc31   :  { %v1427_v27 = vadd.f32 %v1426_v17, %v3499_v3 }
 0xc32   :  { %1631 = vrot.lane.b32.xlu2 %v1626_v4, %s3073_s13  ;;  %v1450_v42 = vpop.f32.mrf.mxu3 }
 0xc33   :  { %v1451_v43 = vadd.f32 %v1450_v42, %v3501_v12 }
 0xc8c   :  { %v1632_v60 = vpop.permute.xlu2 %1631 }
 0xc8d   :  { %v1636_v25 = vadd.f32 %v1632_v60, %v1624_v28 }
 0xc8f   :  { %1655 = vrot.lane.b32.xlu1 %v1636_v25, %s3073_s13  ;;  %2907 = vtanh.f32 %v1636_v25 }
 0xc95   :  { %v2908_v51 = vpop.eup %2907 }
 0xc96   :  { %v1640_v2 = vmul.f32 %v2908_v51, %v1622_v50 }
 0xc9a   :  { %v1630_v52 = vpop.permute.xlu1 %1629 }
 0xc9b   :  { %v1635_v53 = vadd.f32 %v1630_v52, %v1623_v61 }
 0xc9d   :  { %2909 = vtanh.f32 %v1635_v53  ;;  %1653 = vrot.lane.b32.xlu2 %v1635_v53, %s3073_s13 }
 0xca2   :  { %v2780_v59 = vpop.permute.xlu1 %2779 }
 0xca3   :  { %v2910_v54 = vpop.eup %2909  ;;  %v2782_v55 = vunpack.i.h.bf16 %v2780_v59  ;;  %v2781_v46 = vunpack.i.l.bf16 %v2780_v59 }
 0xca4   :  { %v1639_v62 = vmul.f32 %v2910_v54, %v1620_v16 }
 0xca5   :  { %v1340_v6 = vsel %vm138_vm0, %v3470_v39, %v2781_v46  ;;  %v1341_v32 = vsel %vm138_vm0, %v3472_v40, %v2782_v55 }
 0xca6   :  { %v1353_v45 = vpack.c.bf16 %v1341_v32, %v1340_v6  ;;  %v2783_v11 = vpack.i.bf16 %v1640_v2, %v1639_v62 }
 0xca8   :  { %2528 = vmatmul.msk.bf16.gmra.mxu2 %vm190_vm1, %v1353_v45  ;;  %2531 = vmatmul.msk.bf16.gmra.mxu3 %vm190_vm1, %v1353_v45 }
 0xca9   :  { %2784 = vrot.lane.b32.xlu0 %v2783_v11, %s3073_s13 }
 0xcf7   :  { %v1654_v37 = vpop.permute.xlu2 %1653 }
 0xcf8   :  { %v3532_v13 = vsel %vm102_vm7, %v1654_v37, 0.0 }
 0xcf9   :  { %1783 = vrot.lane.b32.xlu0 %v3532_v13, %s3073_s13 }
 0xd01   :  { %v1656_v39 = vpop.permute.xlu1 %1655 }
 0xd02   :  { %v3538_v40 = vsel %vm103_vm9, %v1656_v39, 0.0 }
 0xd03   :  { %1785 = vrot.lane.b32.xlu2 %v3538_v40, %s3073_s13 }
 0xd1b   :  { %v2785_v14 = vpop.permute.xlu0 %2784 }
 0xd1c   :  { %v2787_v38 = vunpack.i.h.bf16 %v2785_v14  ;;  %v2786_v15 = vunpack.i.l.bf16 %v2785_v14 }
 0xd1e   :  { %v3544_v63 = vsel %vm103_vm9, %v2787_v38, 0.0  ;;  %v3548_v16 = vsel %vm102_vm7, %v2786_v15, 0.0 }
 0xd1f   :  { %v1661_v0 = vpack.c.bf16 %v3544_v63, %v3548_v16 }
 0xd21   :  { %2568 = vmatmul.msk.bf16.vlgmr.msra.gmra.mxu1 %vm190_vm1, %v1661_v0  ;;  %2569 = vmatmul.msk.bf16.vlgmr.msrb.gmra.mxu2 %vm190_vm1, %v1661_v0 }
 0xd2b   :  { %v3554_v7 = vpop.f32.mrf.mxu2 }
 0xd33   :  { %v3556_v18 = vpop.f32.mrf.mxu2 }
 0xd9e   :  { %v1674_v20 = vpop.f32.mrf.mxu1 }
 0xd9f   :  { %v1693_v47 = vadd.f32 %v1674_v20, %v1425_v58 }
 0xda1   :  { %v2570_v24 = vmul.f32 -1.442695, %v1693_v47 }
 0xda3   :  { %2911 = vpow2.f32 %v2570_v24 }
 0xda4   :  { %v1688_v21 = vpop.f32.mrf.mxu2 }
 0xda5   :  { %v1694_v9 = vadd.f32 %v1688_v21, %v1449_v30 }
 0xda6   :  { %v1676_v31 = vpop.f32.mrf.mxu1 }
 0xda7   :  { %v2571_v29 = vmul.f32 -1.442695, %v1694_v9  ;;  %v1695_v26 = vadd.f32 %v1676_v31, %v1427_v27 }
 0xda9   :  { %v2912_v1 = vpop.eup %2911  ;;  %2913 = vpow2.f32 %v2571_v29  ;;  %v2572_v36 = vmul.f32 -1.442695, %v1695_v26 }
 0xdaa   :  { %v1713_v10 = vadd.f32 1.0, %v2912_v1 }
 0xdab   :  { %2915 = vpow2.f32 %v2572_v36 }
 0xdac   :  { %2917 = vrcp.f32 %v1713_v10  ;;  %v1690_v50 = vpop.f32.mrf.mxu2  ;;  %v1728_v37 = vand.u32 2147483648, %v1713_v10  ;;  %vm1722_vm2 = vweird.f32 %v1713_v10  ;;  %v1726_v0 = vand.u32 2147483647, %v1713_v10 }
 0xdad   :  { %v1696_v4 = vadd.f32 %v1690_v50, %v1451_v43 }
 0xdae   :  { %v1729_v30 = vor.u32 1.1754944e-38, %v1728_v37  ;;  %vm1727_vm12 = vcmp.eq.f32.partialorder %v1726_v0, 8.507059e+37 }
 0xdaf   :  { %v2914_v28 = vpop.eup %2913  ;;  %v2573_v60 = vmul.f32 -1.442695, %v1696_v4 }
 0xdb0   :  { %v1714_v25 = vadd.f32 1.0, %v2914_v28 }
 0xdb1   :  { %v2916_v61 = vpop.eup %2915  ;;  %2919 = vpow2.f32 %v2573_v60 }
 0xdb2   :  { %v2918_v52 = vpop.eup %2917  ;;  %2921 = vrcp.f32 %v1714_v25  ;;  %v3562_v53 = vadd.f32 1.0, %v2916_v61  ;;  %v1743_v39 = vand.u32 2147483648, %v1714_v25  ;;  %v1741_v38 = vand.u32 2147483647, %v1714_v25 }
 0xdb3   :  { %v1718_v51 = vmul.f32 %v2918_v52, %v1713_v10  ;;  %vm1723_vm7 = vweird.f32 %v2918_v52  ;;  %vm1737_vm6 = vweird.f32 %v1714_v25 }
 0xdb4   :  { %2923 = vrcp.f32 %v3562_v53  ;;  %vm3566_vm5 = vmor %vm1722_vm2, %vm1723_vm7  ;;  %v1744_v20 = vor.u32 1.1754944e-38, %v1743_v39  ;;  %vm1742_vm11 = vcmp.eq.f32.partialorder %v1741_v38, 8.507059e+37  ;;  %v1758_v10 = vand.u32 2147483648, %v3562_v53 }
 0xdb5   :  { %v1719_v59 = vsub.f32 1.0, %v1718_v51  ;;  %vm1752_vm7 = vweird.f32 %v3562_v53 }
 0xdb7   :  { %v2920_v54 = vpop.eup %2919  ;;  %v1720_v62 = vmul.f32 %v2918_v52, %v1719_v59 }
 0xdb8   :  { %v2922_v55 = vpop.eup %2921  ;;  %v1716_v46 = vadd.f32 1.0, %v2920_v54 }
 0xdb9   :  { %v1733_v2 = vmul.f32 %v2922_v55, %v1714_v25  ;;  %v1721_v11 = vadd.f32 %v2918_v52, %v1720_v62  ;;  %vm1738_vm9 = vweird.f32 %v2922_v55 }
 0xdba   :  { %v2924_v6 = vpop.eup %2923  ;;  %2925 = vrcp.f32 %v1716_v46  ;;  %vm1739_vm10 = vmor %vm1737_vm6, %vm1738_vm9  ;;  %v1773_v36 = vand.u32 2147483648, %v1716_v46  ;;  %v1771_v50 = vand.u32 2147483647, %v1716_v46  ;;  %vm1767_vm2 = vweird.f32 %v1716_v46 }
 0xdbb   :  { %2927 = vtanh.f32 %v1694_v9  ;;  %v1734_v32 = vsub.f32 1.0, %v1733_v2  ;;  %v1748_v45 = vmul.f32 %v2924_v6, %v3562_v53  ;;  %v1725_v19 = vsel %vm3566_vm5, %v2918_v52, %v1721_v11 }
 0xdbc   :  { %2929 = vtanh.f32 %v1696_v4  ;;  %v1730_v31 = vsel %vm1727_vm12, %v1729_v30, %v1725_v19  ;;  %vm1753_vm13 = vweird.f32 %v2924_v6  ;;  %v1756_v4 = vand.u32 2147483647, %v3562_v53  ;;  %v1784_v53 = vpop.permute.xlu0 %1783 }
 0xdbd   :  { %v1735_v14 = vmul.f32 %v2922_v55, %v1734_v32  ;;  %v1749_v15 = vsub.f32 1.0, %v1748_v45  ;;  %vm1754_vm9 = vmor %vm1752_vm7, %vm1753_vm13  ;;  %v1774_v25 = vor.u32 1.1754944e-38, %v1773_v36  ;;  %v1759_v52 = vor.u32 1.1754944e-38, %v1758_v10 }
 0xdbe   :  { %vm1772_vm6 = vcmp.eq.f32.partialorder %v1771_v50, 8.507059e+37  ;;  %v1789_v2 = vmul.f32 %v1784_v53, %v1730_v31 }
 0xdbf   :  { %v1736_v17 = vadd.f32 %v2922_v55, %v1735_v14  ;;  %v1750_v47 = vmul.f32 %v2924_v6, %v1749_v15 }
 0xdc0   :  { %v2926_v58 = vpop.eup %2925 }
 0xdc1   :  { %v2928_v24 = vpop.eup %2927  ;;  %v1740_v21 = vsel %vm1739_vm10, %v2922_v55, %v1736_v17  ;;  %v1763_v27 = vmul.f32 %v2926_v58, %v1716_v46  ;;  %v1751_v1 = vadd.f32 %v2924_v6, %v1750_v47  ;;  %vm1768_vm14 = vweird.f32 %v2926_v58 }
 0xdc2   :  { %v1745_v9 = vsel %vm1742_vm11, %v1744_v20, %v1740_v21  ;;  %vm1769_vm5 = vmor %vm1767_vm2, %vm1768_vm14  ;;  %v2930_v61 = vpop.eup %2929  ;;  %vm1757_vm10 = vcmp.eq.f32.partialorder %v1756_v4, 8.507059e+37  ;;  %vm3669_vm11 = vcmp.gt.f32.partialorder %v3345_v49, 0.0  ;;  %v1453_v21 = vpop.f32.mrf.mxu3  ;;  %v1430_v49 = vadd.f32 %v3554_v7, %v3499_v3 }
 0xdc3   :  { %v1778_v29 = vsel %vm114_vm8, %v2928_v24, %v1745_v9  ;;  %v1764_v26 = vsub.f32 1.0, %v1763_v27  ;;  %v1755_v60 = vsel %vm1754_vm9, %v2924_v6, %v1751_v1  ;;  %v1786_v6 = vpop.permute.xlu2 %1785  ;;  %vm3670_vm12 = vmmov %vm3669_vm11  ;;  %v1454_v9 = vadd.f32 %v1453_v21, %v3501_v12 }
 0xdc4   :  { %v1791_v42 = vmul.f32 %v1778_v29, %v1730_v31  ;;  %v1760_v54 = vsel %vm1757_vm10, %v1759_v52, %v1755_v60  ;;  %v1432_v4 = vadd.f32 %v3556_v18, %v3499_v3 }
 0xdc5   :  { %v1765_v43 = vmul.f32 %v2926_v58, %v1764_v26  ;;  %v1790_v45 = vmul.f32 %v1786_v6, %v1760_v54 }
 0xdc6   :  { %1795 = vrot.lane.b32.xlu1 %v1791_v42, %s3073_s13 }
 0xdc7   :  { %v1766_v28 = vadd.f32 %v2926_v58, %v1765_v43 }
 0xdc9   :  { %v1770_v51 = vsel %vm1769_vm5, %v2926_v58, %v1766_v28 }
 0xdca   :  { %v1775_v59 = vsel %vm1772_vm6, %v1774_v25, %v1770_v51  ;;  %v1455_v27 = vpop.f32.mrf.mxu3 }
 0xdcb   :  { %v1780_v55 = vsel %vm114_vm8, %v2930_v61, %v1775_v59  ;;  %v1456_v42 = vadd.f32 %v1455_v27, %v3501_v12 }
 0xdcc   :  { %v1792_v62 = vmul.f32 %v1780_v55, %v1760_v54 }
 0xdce   :  { %1797 = vrot.lane.b32.xlu0 %v1792_v62, %s3073_s13 }
 0xe38   :  { %v1796_v32 = vpop.permute.xlu1 %1795 }
 0xe39   :  { %v1801_v46 = vadd.f32 %v1796_v32, %v1789_v2 }
 0xe3b   :  { %1819 = vrot.lane.b32.xlu1 %v1801_v46, %s3073_s13  ;;  %2931 = vtanh.f32 %v1801_v46 }
 0xe40   :  { %v1798_v11 = vpop.permute.xlu0 %1797 }
 0xe41   :  { %v1802_v37 = vadd.f32 %v1798_v11, %v1790_v45  ;;  %v2932_v39 = vpop.eup %2931 }
 0xe42   :  { %v1805_v38 = vmul.f32 %v2932_v39, %v1778_v29 }
 0xe43   :  { %2933 = vtanh.f32 %v1802_v37  ;;  %1821 = vrot.lane.b32.xlu0 %v1802_v37, %s3073_s13 }
 0xe49   :  { %v2934_v14 = vpop.eup %2933 }
 0xe4a   :  { %v1806_v15 = vmul.f32 %v2934_v14, %v1780_v55 }
 0xe4c   :  { %v2788_v0 = vpack.i.bf16 %v1806_v15, %v1805_v38 }
 0xe4e   :  { %2789 = vrot.lane.b32.xlu2 %v2788_v0, %s3073_s13 }
 0xea8   :  { %v2790_v8 = vpop.permute.xlu2 %2789 }
 0xea9   :  { %v2792_v17 = vunpack.i.h.bf16 %v2790_v8  ;;  %v2791_v58 = vunpack.i.l.bf16 %v2790_v8 }
 0xeab   :  { %v3587_v19 = vsel %vm105_vm3, %v2792_v17, %v3544_v63  ;;  %v3592_v20 = vsel %vm3669_vm11, %v2791_v58, %v3548_v16 }
 0xeac   :  { %v1827_v47 = vpack.c.bf16 %v3587_v19, %v3592_v20 }
 0xead   :  { %v1820_v24 = vpop.permute.xlu1 %1819 }
 0xeae   :  { %2574 = vmatmul.msk.bf16.vlgmr.msrb.gmra.mxu3 %vm190_vm1, %v1827_v47  ;;  %2575 = vmatmul.msk.bf16.vlgmr.msrb.gmra.mxu1 %vm190_vm1, %v1827_v47  ;;  %v1825_v30 = vsel %vm3670_vm12, %v1820_v24, %v3532_v13 }
 0xeaf   :  { %1949 = vrot.lane.b32.xlu2 %v1825_v30, %s3073_s13 }
 0xeb5   :  { %v1822_v63 = vpop.permute.xlu0 %1821 }
 0xeb6   :  { %v1826_v16 = vsel %vm105_vm3, %v1822_v63, %v3538_v40 }
 0xeb7   :  { %1951 = vrot.lane.b32.xlu1 %v1826_v16, %s3073_s13 }
 0xf2b   :  { %v1854_v31 = vpop.f32.mrf.mxu1 }
 0xf2c   :  { %v1860_v29 = vadd.f32 %v1854_v31, %v1454_v9 }
 0xf2e   :  { %v2577_v26 = vmul.f32 -1.442695, %v1860_v29 }
 0xf30   :  { %2935 = vpow2.f32 %v2577_v26 }
 0xf31   :  { %v1840_v13 = vpop.f32.mrf.mxu3 }
 0xf32   :  { %v1859_v1 = vadd.f32 %v1840_v13, %v1430_v49 }
 0xf33   :  { %v1856_v36 = vpop.f32.mrf.mxu1 }
 0xf34   :  { %v2576_v56 = vmul.f32 -1.442695, %v1859_v1  ;;  %v1862_v40 = vadd.f32 %v1856_v36, %v1456_v42 }
 0xf36   :  { %v2936_v10 = vpop.eup %2935  ;;  %2937 = vpow2.f32 %v2576_v56  ;;  %v2579_v43 = vmul.f32 -1.442695, %v1862_v40 }
 0xf37   :  { %v1880_v50 = vadd.f32 1.0, %v2936_v10  ;;  %v1272_v10 = vmul.f32 %v3497_v44, %v3383_v33  ;;  %v1950_v33 = vpop.permute.xlu2 %1949  ;;  %v1952_v44 = vpop.permute.xlu1 %1951 }
 0xf38   :  { %2939 = vpow2.f32 %v2579_v43 }
 0xf39   :  { %2941 = vrcp.f32 %v1880_v50  ;;  %v1842_v28 = vpop.f32.mrf.mxu3  ;;  %v1909_v32 = vand.u32 2147483648, %v1880_v50  ;;  %vm1903_vm13 = vweird.f32 %v1880_v50  ;;  %v1907_v6 = vand.u32 2147483647, %v1880_v50 }
 0xf3a   :  { %v1861_v60 = vadd.f32 %v1842_v28, %v1432_v4  ;;  %v1271_v28 = vmul.f32 %v3495_v34, %v3381_v5 }
 0xf3b   :  { %v1910_v15 = vor.u32 1.1754944e-38, %v1909_v32  ;;  %vm1908_vm9 = vcmp.eq.f32.partialorder %v1907_v6, 8.507059e+37  ;;  %v2704_v32 = vld [vmem:[#allocation5 + $0xc8] sm:$0xff]  ;;  %v2702_v6 = vld [vmem:[#allocation5 + $0xb8] sm:$0xff] }
 0xf3c   :  { %v2938_v7 = vpop.eup %2937  ;;  %v2578_v25 = vmul.f32 -1.442695, %v1861_v60 }
 0xf3d   :  { %v1879_v61 = vadd.f32 1.0, %v2938_v7 }
 0xf3e   :  { %v2940_v52 = vpop.eup %2939  ;;  %2943 = vpow2.f32 %v2578_v25 }
 0xf3f   :  { %v2942_v12 = vpop.eup %2941  ;;  %2945 = vrcp.f32 %v1879_v61  ;;  %v1882_v51 = vadd.f32 1.0, %v2940_v52  ;;  %v1892_v37 = vand.u32 2147483647, %v1879_v61  ;;  %v1894_v39 = vand.u32 2147483648, %v1879_v61 }
 0xf40   :  { %v1899_v59 = vmul.f32 %v2942_v12, %v1880_v50  ;;  %vm1904_vm3 = vweird.f32 %v2942_v12  ;;  %vm1888_vm2 = vweird.f32 %v1879_v61 }
 0xf41   :  { %2947 = vrcp.f32 %v1882_v51  ;;  %vm1905_vm14 = vmor %vm1903_vm13, %vm1904_vm3  ;;  %vm1893_vm6 = vcmp.eq.f32.partialorder %v1892_v37, 8.507059e+37  ;;  %v1895_v24 = vor.u32 1.1754944e-38, %v1894_v39  ;;  %v1939_v27 = vand.u32 2147483648, %v1882_v51 }
 0xf42   :  { %v1900_v54 = vsub.f32 1.0, %v1899_v59  ;;  %vm1933_vm11 = vweird.f32 %v1882_v51 }
 0xf43   :  { %v1940_v56 = vor.u32 1.1754944e-38, %v1939_v27 }
 0xf44   :  { %v2944_v55 = vpop.eup %2943  ;;  %v1901_v62 = vmul.f32 %v2942_v12, %v1900_v54 }
 0xf45   :  { %v2946_v53 = vpop.eup %2945  ;;  %v1881_v2 = vadd.f32 1.0, %v2944_v55 }
 0xf46   :  { %v1884_v3 = vmul.f32 %v2946_v53, %v1879_v61  ;;  %v1902_v18 = vadd.f32 %v2942_v12, %v1901_v62  ;;  %vm1889_vm7 = vweird.f32 %v2946_v53  ;;  %v2798_v61 = vpack.i.bf16 %v1272_v10, %v1271_v28 }
 0xf47   :  { %v2948_v46 = vpop.eup %2947  ;;  %2949 = vrcp.f32 %v1881_v2  ;;  %vm1890_vm5 = vmor %vm1888_vm2, %vm1889_vm7  ;;  %v1924_v13 = vand.u32 2147483648, %v1881_v2  ;;  %v1922_v36 = vand.u32 2147483647, %v1881_v2 }
 0xf48   :  { %2951 = vtanh.f32 %v1860_v29  ;;  %v1885_v45 = vsub.f32 1.0, %v1884_v3  ;;  %v1929_v11 = vmul.f32 %v2948_v46, %v1882_v51  ;;  %v1906_v14 = vsel %vm1905_vm14, %v2942_v12, %v1902_v18  ;;  %v2706_v3 = vld [vmem:[#allocation5 + $0xd8] sm:$0xff]  ;;  %v2705_v18 = vld [vmem:[#allocation5 + $0xd0] sm:$0xff] }
 0xf49   :  { %v1911_v17 = vsel %vm1908_vm9, %v1910_v15, %v1906_v14  ;;  %vm1934_vm10 = vweird.f32 %v2948_v46  ;;  %v1937_v29 = vand.u32 2147483647, %v1882_v51  ;;  %2953 = vtanh.f32 %v1862_v40  ;;  %2069 = vmatpush.bf16.msra.mxu2 %v2706_v3 }
 0xf4a   :  { %v1886_v38 = vmul.f32 %v2946_v53, %v1885_v45  ;;  %v1930_v0 = vsub.f32 1.0, %v1929_v11  ;;  %vm1935_vm12 = vmor %vm1933_vm11, %vm1934_vm10  ;;  %vm1918_vm14 = vweird.f32 %v1881_v2  ;;  %v1925_v40 = vor.u32 1.1754944e-38, %v1924_v13  ;;  %v2701_v45 = vld [vmem:[#allocation5 + $0xb0] sm:$0xff]  ;;  %v2700_v11 = vld [vmem:[#allocation5 + $0xa8] sm:$0xff] }
 0xf4b   :  { %vm1938_vm13 = vcmp.eq.f32.partialorder %v1937_v29, 8.507059e+37  ;;  %vm1923_vm9 = vcmp.eq.f32.partialorder %v1922_v36, 8.507059e+37 }
 0xf4c   :  { %v1887_v8 = vadd.f32 %v2946_v53, %v1886_v38  ;;  %v1931_v58 = vmul.f32 %v2948_v46, %v1930_v0 }
 0xf4d   :  { %v2950_v47 = vpop.eup %2949  ;;  %2070 = vmatpush.bf16.msra.mxu2 %v2705_v18 }
 0xf4e   :  { %v2952_v30 = vpop.eup %2951  ;;  %v1891_v63 = vsel %vm1890_vm5, %v2946_v53, %v1887_v8  ;;  %v1914_v16 = vmul.f32 %v2950_v47, %v1881_v2  ;;  %v1932_v21 = vadd.f32 %v2948_v46, %v1931_v58  ;;  %vm1919_vm3 = vweird.f32 %v2950_v47  ;;  %v2699_v8 = vld [vmem:[#allocation5 + $0xa0] sm:$0xff] }
 0xf4f   :  { %v1896_v9 = vsel %vm1893_vm6, %v1895_v24, %v1891_v63  ;;  %v1944_v31 = vsel %vm114_vm8, %v2952_v30, %v1911_v17  ;;  %vm1920_vm7 = vmor %vm1918_vm14, %vm1919_vm3  ;;  %v2954_v4 = vpop.eup %2953  ;;  %vm2153_vm6 = vcmask 1040384  }
 0xf50   :  { %v1957_v26 = vmul.f32 %v1944_v31, %v1896_v9  ;;  %v1915_v49 = vsub.f32 1.0, %v1914_v16  ;;  %v1936_v42 = vsel %vm1935_vm12, %v2948_v46, %v1932_v21  ;;  %v1955_v54 = vmul.f32 %v1950_v33, %v1896_v9  ;;  %v2703_v46 = vld [vmem:[#allocation5 + $0xc0] sm:$0xff]  ;;  %v2020_v21 = vld [vmem:[#allocation7 + $0x6] ss:$0 sm:$0xff] }
 0xf51   :  { %v1941_v50 = vsel %vm1938_vm13, %v1940_v56, %v1936_v42  ;;  %2071 = vmatpush.bf16.msra.mxu2 %v2704_v32  ;;  %v2134_v32 = vld [vmem:[#allocation7 + $0x12] ss:$0 sm:$0xff] }
 0xf52   :  { %1961 = vrot.lane.b32.xlu0 %v1957_v26, %s3073_s13  ;;  %v1916_v1 = vmul.f32 %v2950_v47, %v1915_v49  ;;  %v1946_v25 = vsel %vm114_vm8, %v2954_v4, %v1941_v50 }
 0xf54   :  { %v1917_v43 = vadd.f32 %v2950_v47, %v1916_v1 }
 0xf55   :  { %2072 = vmatpush.bf16.msra.mxu2 %v2703_v46 }
 0xf56   :  { %v1921_v60 = vsel %vm1920_vm7, %v2950_v47, %v1917_v43 }
 0xf57   :  { %v1926_v7 = vsel %vm1923_vm9, %v1925_v40, %v1921_v60 }
 0xf58   :  { %v1958_v52 = vmul.f32 %v1946_v25, %v1926_v7  ;;  %v1956_v51 = vmul.f32 %v1952_v44, %v1926_v7 }
 0xf59   :  { %2073 = vmatpush.bf16.msra.mxu2 %v2702_v6 }
 0xf5a   :  { %1963 = vrot.lane.b32.xlu2 %v1958_v52, %s3073_s13  ;;  %2799 = vrot.lane.b32.xlu0 %v2798_v61, %s3081_s15 }
 0xf5d   :  { %2074 = vmatpush.bf16.msra.mxu2 %v2701_v45 }
 0xf61   :  { %2075 = vmatpush.bf16.msra.mxu2 %v2700_v11 }
 0xf65   :  { %2076 = vmatpush.bf16.msra.mxu2 %v2699_v8 }
 0xfb4   :  { %v1964_v12 = vpop.permute.xlu2 %1963 }
 0xfb5   :  { %v1968_v59 = vadd.f32 %v1964_v12, %v1956_v51 }
 0xfb7   :  { %2955 = vtanh.f32 %v1968_v59  ;;  %v2708_v59 = vld [vmem:[#allocation5 + $0xe8] sm:$0xff] }
 0xfb8   :  { %2182 = vmatpush.bf16.msra.mxu3 %v2708_v59 }
 0xfbd   :  { %v2956_v34 = vpop.eup %2955 }
 0xfbe   :  { %v1972_v53 = vmul.f32 %v2956_v34, %v1946_v25 }
 0xfc4   :  { %v1962_v55 = vpop.permute.xlu0 %1961 }
 0xfc5   :  { %v1967_v5 = vadd.f32 %v1962_v55, %v1955_v54  ;;  %v2707_v55 = vld [vmem:[#allocation5 + $0xe0] sm:$0xff] }
 0xfc6   :  { %2183 = vmatpush.bf16.msra.mxu3 %v2707_v55 }
 0xfc7   :  { %2957 = vtanh.f32 %v1967_v5 }
 0xfcc   :  { %v2800_v17 = vpop.permute.xlu0 %2799 }
 0xfcd   :  { %v2958_v62 = vpop.eup %2957  ;;  %v2802_v58 = vunpack.i.h.bf16 %v2800_v17  ;;  %v2801_v47 = vunpack.i.l.bf16 %v2800_v17 }
 0xfce   :  { %v1971_v41 = vmul.f32 %v2958_v62, %v1944_v31 }
 0xfcf   :  { %v2000_v16 = vsel %vm138_vm0, %v3430_v23, %v2802_v58  ;;  %v1999_v57 = vsel %vm138_vm0, %v3428_v22, %v2801_v47 }
 0xfd0   :  { %v2793_v2 = vpack.i.bf16 %v1972_v53, %v1971_v41 }
 0xfd2   :  { %2794 = vrot.lane.b32.xlu1 %v2793_v2, %s3073_s13  ;;  %v2131_v2 = vld [vmem:[#allocation7 + $0x11] ss:$0 sm:$0xff] }
0x1044   :  { %v2795_v37 = vpop.permute.xlu1 %2794 }
0x1045   :  { %v2797_v39 = vunpack.i.h.bf16 %v2795_v37  ;;  %v2796_v14 = vunpack.i.l.bf16 %v2795_v37 }
0x1047   :  { %v1981_v38 = vsel %vm106_vm4, %v2796_v14, %v3592_v20  ;;  %v1982_v15 = vsel %vm107_vm15, %v2797_v39, %v3587_v19 }
0x1048   :  { %v2803_v0 = vpack.i.bf16 %v1982_v15, %v1981_v38 }
0x104a   :  { %2804 = vrot.lane.b32.xlu2 %v2803_v0, %s3073_s13  ;;  %s2265_s13 = sshll.u32 %s3084_s3, 4  ;;  %s2266_s13 = int_to_ptr.vmem [resolvable:$true] %s2265_s13 }
0x10a4   :  { %v2805_v24 = vpop.permute.xlu2 %2804 }
0x10a5   :  { %v2807_v30 = vunpack.i.h.bf16 %v2805_v24  ;;  %v2806_v63 = vunpack.i.l.bf16 %v2805_v24 }
0x10a7   :  { %v2001_v48 = vsel %vm190_vm1, %v1999_v57, %v2806_v63  ;;  %v2002_v19 = vsel %vm190_vm1, %v2000_v16, %v2807_v30 }
0x10a8   :  { %v2019_v20 = vpack.c.bf16 %v2002_v19, %v2001_v48 }
0x10aa   :  { %2077 = vmatmul.bf16.vlgmr.msra.gmra.mxu2 %v2019_v20 }
0x112d   :  { %v2078_v27 = vpop.f32.mrf.mxu2 }
0x112e   :  { %v2079_v9 = vadd.f32 %v2078_v27, %v2020_v21 }
0x1130   :  { %v2083_v31 = vmul.f32 0.33333334, %v2079_v9 }
0x1132   :  { %v2085_v29 = vadd.f32 %v2083_v31, %v3428_v22 }
0x1134   :  { %v2087_v26 = vsel %vm138_vm0, %v2085_v29, 0.0 }
0x1135   :  { %v2080_v49 = vpop.f32.mrf.mxu2  ;;  %2088 = vadd.xlane.f32.xlu1 %v2087_v26  ;;  %v2710_v26 = vld [vmem:[#allocation5 + $0xf8] sm:$0xff] }
0x1136   :  { %v2081_v13 = vadd.f32 %v2080_v49, %v2020_v21  ;;  %2217 = vmatpush.bf16.msra.mxu1 %v2710_v26  ;;  %v2709_v49 = vld [vmem:[#allocation5 + $0xf0] sm:$0xff] }
0x1138   :  { %v2084_v42 = vmul.f32 0.33333334, %v2081_v13  ;;  %v2712_v13 = vld [vmem:[#allocation5 + $0x108] sm:$0xff] }
0x1139   :  { %2252 = vmatpush.bf16.msrb.mxu0 %v2712_v13 }
0x113a   :  { %v2086_v1 = vadd.f32 %v2084_v42, %v3430_v23  ;;  %2218 = vmatpush.bf16.msra.mxu1 %v2709_v49  ;;  %v2711_v42 = vld [vmem:[#allocation5 + $0x100] sm:$0xff] }
0x113c   :  { %v2090_v36 = vsel %vm138_vm0, %v2086_v1, 0.0 }
0x113d   :  { %2091 = vadd.xlane.f32.xlu0 %v2090_v36  ;;  %2253 = vmatpush.bf16.msrb.mxu0 %v2711_v42 }
0x11a8   :  { %v2089_v56 = vpop.xlane.xlu1 %2088 }
0x11a9   :  { %v2093_v10 = vmul.f32 %v2089_v56, %v3420_v35 }
0x11ab   :  { %v2095_v43 = vsub.f32 %v2085_v29, %v2093_v10 }
0x11ad   :  { %v2097_v50 = vmul.f32 %v2095_v43, %v2095_v43 }
0x11af   :  { %v2099_v40 = vsel %vm138_vm0, %v2097_v50, 0.0 }
0x11b0   :  { %v2092_v4 = vpop.xlane.xlu0 %2091  ;;  %2100 = vadd.xlane.f32.xlu2 %v2099_v40  ;;  %v2195_v40 = vld [vmem:[#allocation7 + $0x14] ss:$0 sm:$0xff] }
0x11b1   :  { %v2094_v22 = vmul.f32 %v2092_v4, %v3420_v35 }
0x11b3   :  { %v2096_v28 = vsub.f32 %v2086_v1, %v2094_v22  ;;  %v2160_v1 = vld [vmem:[#allocation7 + $0x13] ss:$0 sm:$0xff] }
0x11b5   :  { %v2098_v60 = vmul.f32 %v2096_v28, %v2096_v28 }
0x11b7   :  { %v2102_v7 = vsel %vm138_vm0, %v2098_v60, 0.0 }
0x11b8   :  { %2103 = vadd.xlane.f32.xlu1 %v2102_v7 }
0x1223   :  { %v2101_v23 = vpop.xlane.xlu2 %2100 }
0x1224   :  { %v2105_v25 = vmul.f32 %v2101_v23, %v3420_v35  ;;  %v2230_v23 = vld [vmem:[#allocation7 + $0x15] ss:$0 sm:$0xff] }
0x1226   :  { %v2107_v61 = vadd.f32 1e-05, %v2105_v25 }
0x1228   :  { %2959 = vrsqrt.f32 %v2107_v61  ;;  %vm2115_vm8 = vweird.f32 %v2107_v61 }
0x122b   :  { %v2104_v52 = vpop.xlane.xlu1 %2103 }
0x122c   :  { %v2106_v33 = vmul.f32 %v2104_v52, %v3420_v35 }
0x122e   :  { %v2960_v44 = vpop.eup %2959  ;;  %v2108_v12 = vadd.f32 1e-05, %v2106_v33 }
0x122f   :  { %v2110_v51 = vmul.f32 %v2960_v44, %v2107_v61  ;;  %vm2116_vm1 = vweird.f32 %v2960_v44 }
0x1230   :  { %2961 = vrsqrt.f32 %v2108_v12  ;;  %vm2117_vm4 = vmor %vm2115_vm8, %vm2116_vm1  ;;  %vm2125_vm2 = vweird.f32 %v2108_v12 }
0x1231   :  { %v2111_v54 = vmul.f32 %v2960_v44, %v2110_v51 }
0x1233   :  { %v2112_v5 = vmul.f32 0.5, %v2111_v54 }
0x1235   :  { %v2113_v34 = vsub.f32 1.5, %v2112_v5 }
0x1236   :  { %v2962_v62 = vpop.eup %2961 }
0x1237   :  { %v2114_v41 = vmul.f32 %v2960_v44, %v2113_v34  ;;  %v2120_v53 = vmul.f32 %v2962_v62, %v2108_v12  ;;  %vm2126_vm15 = vweird.f32 %v2962_v62 }
0x1238   :  { %vm2127_vm5 = vmor %vm2125_vm2, %vm2126_vm15 }
0x1239   :  { %v2118_v3 = vsel %vm2117_vm4, %v2960_v44, %v2114_v41  ;;  %v2121_v35 = vmul.f32 %v2962_v62, %v2120_v53 }
0x123a   :  { %v2129_v18 = vmul.f32 %v2118_v3, %v2095_v43 }
0x123b   :  { %v2122_v46 = vmul.f32 0.5, %v2121_v35 }
0x123c   :  { %v2132_v6 = vmul.f32 %v2131_v2, %v2129_v18 }
0x123d   :  { %v2123_v45 = vsub.f32 1.5, %v2122_v46 }
0x123e   :  { %v2135_v11 = vadd.f32 %v2134_v32, %v2132_v6 }
0x123f   :  { %v2124_v37 = vmul.f32 %v2962_v62, %v2123_v45 }
0x1240   :  { %v2137_v39 = vmax.f32 %v2135_v11, 0.0 }
0x1241   :  { %v2128_v14 = vsel %vm2127_vm5, %v2962_v62, %v2124_v37 }
0x1242   :  { %v2139_v38 = vsel %vm138_vm0, %v2137_v39, -inf  ;;  %v2130_v15 = vmul.f32 %v2128_v14, %v2096_v28 }
0x1243   :  { %v2140_v0 = vrot.slane %v2139_v38, 4 }
0x1244   :  { %v2133_v8 = vmul.f32 %v2131_v2, %v2130_v15 }
0x1245   :  { %v2141_v17 = vmax.f32 %v2139_v38, %v2140_v0 }
0x1246   :  { %v2136_v58 = vadd.f32 %v2134_v32, %v2133_v8 }
0x1247   :  { %v2142_v24 = vrot.slane %v2141_v17, 2 }
0x1248   :  { %v2138_v47 = vmax.f32 %v2136_v58, 0.0 }
0x1249   :  { %v2143_v57 = vmax.f32 %v2141_v17, %v2142_v24 }
0x124a   :  { %v2146_v30 = vsel %vm138_vm0, %v2138_v47, -inf }
0x124b   :  { %v2147_v63 = vrot.slane %v2146_v30, 4  ;;  %v2144_v19 = vrot.slane %v2143_v57, 1 }
0x124d   :  { %v2148_v16 = vmax.f32 %v2146_v30, %v2147_v63  ;;  %v2145_v27 = vmax.f32 %v2143_v57, %v2144_v19 }
0x124f   :  { %v2149_v48 = vrot.slane %v2148_v16, 2 }
0x1251   :  { %v2150_v20 = vmax.f32 %v2148_v16, %v2149_v48 }
0x1253   :  { %v2151_v21 = vrot.slane %v2150_v20, 1 }
0x1255   :  { %v2152_v9 = vmax.f32 %v2150_v20, %v2151_v21 }
0x1257   :  { %v2154_v31 = vsel %vm2153_vm6, %v2145_v27, %v2152_v9 }
0x1258   :  { %v2159_v29 = vpack.c.bf16 %v2154_v31, %v2154_v31 }
0x125a   :  { %2620 = vmatmul.msk.bf16.vlgmr.msra.gmra.mxu3 %vm138_vm0, %v2159_v29 }
0x12dd   :  { %v2185_v36 = vpop.f32.mrf.mxu3 }
0x12de   :  { %v2186_v56 = vadd.f32 %v2185_v36, %v2160_v1 }
0x12e0   :  { %v2189_v10 = vmax.f32 %v2186_v56, 0.0 }
0x12e2   :  { %v2194_v43 = vpack.c.bf16 %v2189_v10, %v2189_v10 }
0x12e4   :  { %2629 = vmatmul.msk.bf16.vlgmr.msra.gmra.mxu1 %vm138_vm0, %v2194_v43 }
0x12e5   :  { %v2187_v50 = vpop.f32.mrf.mxu3 }
0x1361   :  { %v2220_v4 = vpop.f32.mrf.mxu1 }
0x1362   :  { %v2221_v22 = vadd.f32 %v2220_v4, %v2195_v40 }
0x1364   :  { %v2224_v28 = vmax.f32 %v2221_v22, 0.0 }
0x1366   :  { %v2229_v60 = vpack.c.bf16 %v2224_v28, %v2224_v28 }
0x1368   :  { %2638 = vmatmul.msk.bf16.vlgmr.msrb.gmra.mxu0 %vm138_vm0, %v2229_v60 }
0x1369   :  { %v2222_v7 = vpop.f32.mrf.mxu1 }
0x13e5   :  { %v2255_v25 = vpop.f32.mrf.mxu0 }
0x13e6   :  { %v2256_v61 = vadd.f32 %v2255_v25, %v2230_v23 }
0x13e8   :  { %2259 = vst [vmem:[#allocation8] sm:$0x3] %v2256_v61 }
0x13e9   :  { %2270 = dma.vmem_to_hbm [thread:$0]  %s2266_s13, 32, %s2268_s21, [#allocation4]  }
0x13ed   :  { %v2257_v52 = vpop.f32.mrf.mxu0 }
0x13ee   :  { %3070 = dma.done.wait [#allocation4], 32  }
0x13ef   :  { %3071 = vsyncadd [#allocation4], 4294967264 }
0x13f0   :  { %2275 = vsyncpa [#allocation3], 1 }
0x13f1   :  { %2276 = vsyncpa [#allocation6], 1 }
0x13f2   :  { %2277 = vsyncpa [#allocation4], 1 }

</bundles_post_ra>
